<compile_context>
chip_gen: v7x
topology: tpu7x:2x2x1
jax: 0.10.0
libtpu: 0.0.40
codegen_flags: <defaults>
</compile_context>

<pallas_src>
import math

import jax
import jax.numpy as jnp
from jax.experimental import pallas as pl
from jax.experimental.pallas import tpu as pltpu

# ----------------------------- model config --------------------------------
D_MODEL = 32
N_HEADS = 4
D_K = D_MODEL // N_HEADS
D_FF = 64
N_LAYERS = 2
EPS = 1e-6


# ------------------------------ fused kernel --------------------------------
def encoder_kernel(x_ref, amask_ref, hmask_ref, lnp_ref,
                   wq_ref, bq_ref, wk_ref, bk_ref, wv_ref, bv_ref,
                   wo_ref, bo_ref, w1_ref, b1_ref, w2_ref, b2_ref, o_ref):
    """Whole encoder forward: N_LAYERS pre-norm blocks + final LayerNorm.

    x_ref     : (B*S, D)        activations (VMEM)
    amask_ref : (B*S, H*B*S)    additive attention mask (0 / -1e9), per head block
    hmask_ref : (H*B*S, D)      head selector: 1 where row-head == col-head
    lnp_ref   : (4*L + 2,)      LayerNorm scalars in SMEM
    wq/wk/wv  : (L, D, D), b*: (L, 1, D)
    wo        : (L, D, D), bo : (L, 1, D)
    w1        : (L, D, D_FF), b1: (L, 1, D_FF)
    w2        : (L, D_FF, D), b2: (L, 1, D)
    o_ref     : (B*S, D)
    """
    n_layers = wq_ref.shape[0]
    D = x_ref.shape[-1]
    dk = D // N_HEADS
    scale = 1.0 / math.sqrt(dk)

    x = x_ref[...].astype(jnp.float32)           # (BS, D), stays VMEM/vreg resident
    amask = amask_ref[...]                       # (BS, H*BS) additive mask
    hmask = hmask_ref[...]                       # (H*BS, D)  head block selector

    def layer_norm(v, alpha, bias):
        mean = jnp.mean(v, axis=-1, keepdims=True)
        var = jnp.sum((v - mean) ** 2, axis=-1, keepdims=True) * (1.0 / (D - 1))
        # fold alpha into the reciprocal (EUP slot), FMA-shaped finish
        inv = alpha * pl.reciprocal(jnp.sqrt(var) + EPS, approx=False)
        return (v - mean) * inv + bias

    for l in range(n_layers):                    # static unroll over layers
        a1 = lnp_ref[4 * l + 0]
        c1 = lnp_ref[4 * l + 1]
        a2 = lnp_ref[4 * l + 2]
        c2 = lnp_ref[4 * l + 3]

        # -------- self-attention sublayer (pre-norm residual) --------------
        xn = layer_norm(x, a1, c1)
        q = jnp.dot(xn, wq_ref[l], preferred_element_type=jnp.float32) + bq_ref[l]
        k = jnp.dot(xn, wk_ref[l], preferred_element_type=jnp.float32) + bk_ref[l]
        v = jnp.dot(xn, wv_ref[l], preferred_element_type=jnp.float32) + bv_ref[l]

        # Block-diagonal (per head) packed K / V: row m = (head h, key j),
        # only head h's dk lanes are non-zero.
        kbd = jnp.concatenate([k] * N_HEADS, axis=0) * hmask   # (H*BS, D)
        vbd = jnp.concatenate([v] * N_HEADS, axis=0) * hmask   # (H*BS, D)

        # All heads' scores in one matmul: s[i, h*BS+j] = q_h[i] . k_h[j]
        s = jax.lax.dot_general(q, kbd, (((1,), (1,)), ((), ())),
                                preferred_element_type=jnp.float32)       # (BS, H*BS)
        s = s * scale + amask
        # Per-row constant shift (same constant for every head of the row) —
        # softmax within each head block is unchanged, stability preserved.
        s = s - jnp.max(s, axis=-1, keepdims=True)
        p = jnp.exp(s)                                                    # (BS, H*BS)

        # Unnormalised per-head P@V, packed back to (BS, D) with heads on lanes.
        o_un = jnp.dot(p, vbd, preferred_element_type=jnp.float32)        # (BS, D)
        # Per-head softmax denominators, broadcast straight into the same layout.
        denom = jnp.dot(p, hmask, preferred_element_type=jnp.float32)     # (BS, D)
        o_att = o_un * pl.reciprocal(denom, approx=False)

        attn = jnp.dot(o_att, wo_ref[l],
                       preferred_element_type=jnp.float32) + bo_ref[l]    # (BS, D)
        x = x + attn                              # dropout is identity (eval mode)

        # -------- feed-forward sublayer (pre-norm residual) -----------------
        xn2 = layer_norm(x, a2, c2)
        h1 = jnp.dot(xn2, w1_ref[l], preferred_element_type=jnp.float32) + b1_ref[l]
        h1 = jnp.maximum(h1, 0.0)                 # ReLU
        ff = jnp.dot(h1, w2_ref[l], preferred_element_type=jnp.float32) + b2_ref[l]
        x = x + ff

    # -------- final LayerNormalization (Encoder.norm) -----------------------
    fa = lnp_ref[4 * n_layers + 0]
    fb = lnp_ref[4 * n_layers + 1]
    o_ref[...] = layer_norm(x, fa, fb).astype(o_ref.dtype)


# ------------------------------ wrapper --------------------------------------
def encoder_forward(x, mask, params):
    B, S, D = x.shape
    BS = B * S
    H = N_HEADS
    x2d = x.reshape(BS, D)                       # free row-major reshape

    # Precomputed additive attention mask (padding + cross-batch block diag),
    # replicated per head along lanes. Built once per call, hoisted out of the
    # kernel's layer loop.
    bids = jnp.repeat(jnp.arange(B), S)                              # (BS,)
    keym = mask.reshape(BS)                                          # (BS,) 1/0
    allowed = (bids[:, None] == bids[None, :]) & (keym[None, :] > 0)
    amask = jnp.where(allowed, 0.0, -1e9).astype(jnp.float32)        # (BS, BS)
    amask_wide = jnp.tile(amask, (1, H))                             # (BS, H*BS)

    # Head selector: row m (= head h, key j) matches column c iff c is in
    # head h's dk-lane block.
    head_row = jnp.repeat(jnp.arange(H), BS)                         # (H*BS,)
    head_col = jnp.repeat(jnp.arange(H), D // H)                     # (D,)
    hmask = (head_row[:, None] == head_col[None, :]).astype(jnp.float32)  # (H*BS, D)

    vmem = pl.BlockSpec(memory_space=pltpu.MemorySpace.VMEM)
    smem = pl.BlockSpec(memory_space=pltpu.MemorySpace.SMEM)
    out = pl.pallas_call(
        encoder_kernel,
        out_shape=jax.ShapeDtypeStruct((BS, D), x.dtype),
        in_specs=[vmem,          # x2d
                  vmem,          # amask_wide
                  vmem,          # hmask
                  smem] +        # LayerNorm scalars
                 [vmem] * 12,    # wq,bq,wk,bk,wv,bv,wo,bo,w1,b1,w2,b2
        out_specs=vmem,
    )(x2d, amask_wide, hmask, params["lnp"],
      params["wq"], params["bq"], params["wk"], params["bk"],
      params["wv"], params["bv"], params["wo"], params["bo"],
      params["w1"], params["b1"], params["w2"], params["b2"])
    return out.reshape(B, S, D)


# ------------------------------ params ---------------------------------------
def init_params(key):
    """Layer-stacked weights (single arrays with a leading layer axis)."""
    def dense(k, fan_in, fan_out):
        kw, kb = jax.random.split(k)
        w = jax.random.normal(kw, (fan_in, fan_out), jnp.float32) * 0.02
        b = jax.random.normal(kb, (fan_out,), jnp.float32) * 0.02
        return w, b

    names = ["wq", "bq", "wk", "bk", "wv", "bv", "wo", "bo", "w1", "b1", "w2", "b2"]
    stacks = {n: [] for n in names}
    ln_vals = []
    for _ in range(N_LAYERS):
        keys = jax.random.split(key, 7)
        key = keys[0]
        for tag, kk, fi, fo in [("q", keys[1], D_MODEL, D_MODEL),
                                ("k", keys[2], D_MODEL, D_MODEL),
                                ("v", keys[3], D_MODEL, D_MODEL),
                                ("o", keys[4], D_MODEL, D_MODEL),
                                ("1", keys[5], D_MODEL, D_FF),
                                ("2", keys[6], D_FF, D_MODEL)]:
            w, b = dense(kk, fi, fo)
            stacks["w" + tag].append(w)
            stacks["b" + tag].append(b[None, :])          # (1, fan_out)
        # LayerNormalization params (alpha=1, bias=0) for the two sublayers
        ln_vals += [1.0, 0.0, 1.0, 0.0]
    ln_vals += [1.0, 0.0]                                  # Encoder.norm
    params = {n: jnp.stack(v) for n, v in stacks.items()}
    params["lnp"] = jnp.array(ln_vals, jnp.float32)
    return params


# ------------------------------ main -----------------------------------------
if __name__ == "__main__":
    B, S = 2, 8
    key = jax.random.PRNGKey(0)
    kx, kp = jax.random.split(key)
    x = jax.random.normal(kx, (B, S, D_MODEL), jnp.float32)
    # padding mask: 1 = attend, 0 = masked (last two tokens of batch 1 padded)
    mask = jnp.ones((B, S), jnp.float32).at[1, -2:].set(0.0)

    params = init_params(kp)

    fwd = jax.jit(encoder_forward)
    out = fwd(x, mask, params)
    out = jax.block_until_ready(out)

    assert out.shape == (B, S, D_MODEL)
    assert bool(jnp.all(jnp.isfinite(out)))
    print("KERNEL_OK")
</pallas_src>

<mosaic_0001>
module attributes {stable_mosaic.version = 11 : i64} {
  func.func @encoder_kernel(%arg0: memref<16x32xf32, #tpu.memory_space<vmem>>, %arg1: memref<16x64xf32, #tpu.memory_space<vmem>>, %arg2: memref<64x32xf32, #tpu.memory_space<vmem>>, %arg3: memref<10xf32, #tpu.memory_space<smem>>, %arg4: memref<2x32x32xf32, #tpu.memory_space<vmem>>, %arg5: memref<2x1x32xf32, #tpu.memory_space<vmem>>, %arg6: memref<2x32x32xf32, #tpu.memory_space<vmem>>, %arg7: memref<2x1x32xf32, #tpu.memory_space<vmem>>, %arg8: memref<2x32x32xf32, #tpu.memory_space<vmem>>, %arg9: memref<2x1x32xf32, #tpu.memory_space<vmem>>, %arg10: memref<2x32x32xf32, #tpu.memory_space<vmem>>, %arg11: memref<2x1x32xf32, #tpu.memory_space<vmem>>, %arg12: memref<2x32x64xf32, #tpu.memory_space<vmem>>, %arg13: memref<2x1x64xf32, #tpu.memory_space<vmem>>, %arg14: memref<2x64x32xf32, #tpu.memory_space<vmem>>, %arg15: memref<2x1x32xf32, #tpu.memory_space<vmem>>, %arg16: memref<16x32xf32, #tpu.memory_space<vmem>>) attributes {dimension_semantics = [], scalar_prefetch = 0 : i64, scratch_operands = 0 : i64, tpu.core_type = #tpu.core_type<tc>} {
    %c0 = arith.constant 0 : index
    %c0_0 = arith.constant 0 : index
    %0 = vector.load %arg0[%c0, %c0_0] : memref<16x32xf32, #tpu.memory_space<vmem>>, vector<16x32xf32>
    %c0_1 = arith.constant 0 : index
    %c0_2 = arith.constant 0 : index
    %1 = vector.load %arg1[%c0_1, %c0_2] : memref<16x64xf32, #tpu.memory_space<vmem>>, vector<16x64xf32>
    %c0_3 = arith.constant 0 : index
    %c0_4 = arith.constant 0 : index
    %2 = vector.load %arg2[%c0_3, %c0_4] : memref<64x32xf32, #tpu.memory_space<vmem>>, vector<64x32xf32>
    %c0_5 = arith.constant 0 : index
    %3 = memref.load %arg3[%c0_5] : memref<10xf32, #tpu.memory_space<smem>>
    %c1 = arith.constant 1 : index
    %4 = memref.load %arg3[%c1] : memref<10xf32, #tpu.memory_space<smem>>
    %c2 = arith.constant 2 : index
    %5 = memref.load %arg3[%c2] : memref<10xf32, #tpu.memory_space<smem>>
    %c3 = arith.constant 3 : index
    %6 = memref.load %arg3[%c3] : memref<10xf32, #tpu.memory_space<smem>>
    %cst = arith.constant dense<0.000000e+00> : vector<16xf32>
    %7 = vector.multi_reduction <add>, %0, %cst [1] : vector<16x32xf32> to vector<16xf32>
    %8 = vector.shape_cast %7 : vector<16xf32> to vector<16x1xf32>
    %cst_6 = arith.constant 3.200000e+01 : f32
    %9 = vector.broadcast %cst_6 : f32 to vector<16x1xf32>
    %10 = arith.divf %8, %9 : vector<16x1xf32>
    %11 = vector.broadcast %10 : vector<16x1xf32> to vector<16x32xf32>
    %12 = arith.subf %0, %11 : vector<16x32xf32>
    %13 = arith.mulf %12, %12 : vector<16x32xf32>
    %cst_7 = arith.constant dense<0.000000e+00> : vector<16xf32>
    %14 = vector.multi_reduction <add>, %13, %cst_7 [1] : vector<16x32xf32> to vector<16xf32>
    %15 = vector.shape_cast %14 : vector<16xf32> to vector<16x1xf32>
    %cst_8 = arith.constant 0.0322580636 : f32
    %16 = vector.broadcast %cst_8 : f32 to vector<16x1xf32>
    %17 = arith.mulf %15, %16 : vector<16x1xf32>
    %18 = math.sqrt %17 : vector<16x1xf32>
    %cst_9 = arith.constant 9.99999997E-7 : f32
    %19 = vector.broadcast %cst_9 : f32 to vector<16x1xf32>
    %20 = arith.addf %18, %19 : vector<16x1xf32>
    %21 = tpu.reciprocal %20 : vector<16x1xf32> -> vector<16x1xf32>
    %22 = vector.broadcast %3 : f32 to vector<16x1xf32>
    %23 = arith.mulf %22, %21 : vector<16x1xf32>
    %24 = vector.broadcast %10 : vector<16x1xf32> to vector<16x32xf32>
    %25 = arith.subf %0, %24 : vector<16x32xf32>
    %26 = vector.broadcast %23 : vector<16x1xf32> to vector<16x32xf32>
    %27 = arith.mulf %25, %26 : vector<16x32xf32>
    %28 = vector.broadcast %4 : f32 to vector<16x32xf32>
    %29 = arith.addf %27, %28 : vector<16x32xf32>
    %c0_10 = arith.constant 0 : index
    %c0_11 = arith.constant 0 : index
    %c0_12 = arith.constant 0 : index
    %30 = vector.load %arg4[%c0_10, %c0_11, %c0_12] : memref<2x32x32xf32, #tpu.memory_space<vmem>>, vector<1x32x32xf32>
    %31 = vector.shape_cast %30 : vector<1x32x32xf32> to vector<32x32xf32>
    %cst_13 = arith.constant dense<0.000000e+00> : vector<16x32xf32>
    %32 = tpu.matmul %29, %31, %cst_13 {dimension_numbers = #tpu.dot_dimension_numbers<[1], [0], [0], [1], [0, 0, 1, 1], [], []>} : vector<16x32xf32>, vector<32x32xf32>, vector<16x32xf32> -> vector<16x32xf32>
    %c0_14 = arith.constant 0 : index
    %c0_15 = arith.constant 0 : index
    %c0_16 = arith.constant 0 : index
    %33 = vector.load %arg5[%c0_14, %c0_15, %c0_16] : memref<2x1x32xf32, #tpu.memory_space<vmem>>, vector<1x1x32xf32>
    %34 = vector.shape_cast %33 : vector<1x1x32xf32> to vector<1x32xf32>
    %35 = vector.broadcast %34 : vector<1x32xf32> to vector<16x32xf32>
    %36 = arith.addf %32, %35 : vector<16x32xf32>
    %c0_17 = arith.constant 0 : index
    %c0_18 = arith.constant 0 : index
    %c0_19 = arith.constant 0 : index
    %37 = vector.load %arg6[%c0_17, %c0_18, %c0_19] : memref<2x32x32xf32, #tpu.memory_space<vmem>>, vector<1x32x32xf32>
    %38 = vector.shape_cast %37 : vector<1x32x32xf32> to vector<32x32xf32>
    %cst_20 = arith.constant dense<0.000000e+00> : vector<16x32xf32>
    %39 = tpu.matmul %29, %38, %cst_20 {dimension_numbers = #tpu.dot_dimension_numbers<[1], [0], [0], [1], [0, 0, 1, 1], [], []>} : vector<16x32xf32>, vector<32x32xf32>, vector<16x32xf32> -> vector<16x32xf32>
    %c0_21 = arith.constant 0 : index
    %c0_22 = arith.constant 0 : index
    %c0_23 = arith.constant 0 : index
    %40 = vector.load %arg7[%c0_21, %c0_22, %c0_23] : memref<2x1x32xf32, #tpu.memory_space<vmem>>, vector<1x1x32xf32>
    %41 = vector.shape_cast %40 : vector<1x1x32xf32> to vector<1x32xf32>
    %42 = vector.broadcast %41 : vector<1x32xf32> to vector<16x32xf32>
    %43 = arith.addf %39, %42 : vector<16x32xf32>
    %c0_24 = arith.constant 0 : index
    %c0_25 = arith.constant 0 : index
    %c0_26 = arith.constant 0 : index
    %44 = vector.load %arg8[%c0_24, %c0_25, %c0_26] : memref<2x32x32xf32, #tpu.memory_space<vmem>>, vector<1x32x32xf32>
    %45 = vector.shape_cast %44 : vector<1x32x32xf32> to vector<32x32xf32>
    %cst_27 = arith.constant dense<0.000000e+00> : vector<16x32xf32>
    %46 = tpu.matmul %29, %45, %cst_27 {dimension_numbers = #tpu.dot_dimension_numbers<[1], [0], [0], [1], [0, 0, 1, 1], [], []>} : vector<16x32xf32>, vector<32x32xf32>, vector<16x32xf32> -> vector<16x32xf32>
    %c0_28 = arith.constant 0 : index
    %c0_29 = arith.constant 0 : index
    %c0_30 = arith.constant 0 : index
    %47 = vector.load %arg9[%c0_28, %c0_29, %c0_30] : memref<2x1x32xf32, #tpu.memory_space<vmem>>, vector<1x1x32xf32>
    %48 = vector.shape_cast %47 : vector<1x1x32xf32> to vector<1x32xf32>
    %49 = vector.broadcast %48 : vector<1x32xf32> to vector<16x32xf32>
    %50 = arith.addf %46, %49 : vector<16x32xf32>
    %51 = tpu.concatenate %43, %43, %43, %43 in 0 : vector<16x32xf32>, vector<16x32xf32>, vector<16x32xf32>, vector<16x32xf32> -> vector<64x32xf32>
    %52 = arith.mulf %51, %2 : vector<64x32xf32>
    %53 = tpu.concatenate %50, %50, %50, %50 in 0 : vector<16x32xf32>, vector<16x32xf32>, vector<16x32xf32>, vector<16x32xf32> -> vector<64x32xf32>
    %54 = arith.mulf %53, %2 : vector<64x32xf32>
    %cst_31 = arith.constant dense<0.000000e+00> : vector<16x64xf32>
    %55 = tpu.matmul %36, %52, %cst_31 {dimension_numbers = #tpu.dot_dimension_numbers<[1], [1], [0], [0], [0, 0, 1, 0], [], []>} : vector<16x32xf32>, vector<64x32xf32>, vector<16x64xf32> -> vector<16x64xf32>
    %cst_32 = arith.constant 0.353553385 : f32
    %56 = vector.broadcast %cst_32 : f32 to vector<16x64xf32>
    %57 = arith.mulf %55, %56 : vector<16x64xf32>
    %58 = arith.addf %57, %1 : vector<16x64xf32>
    %cst_33 = arith.constant dense<0xFF800000> : vector<16xf32>
    %59 = vector.multi_reduction <maximumf>, %58, %cst_33 [1] : vector<16x64xf32> to vector<16xf32>
    %60 = vector.shape_cast %59 : vector<16xf32> to vector<16x1xf32>
    %61 = vector.broadcast %60 : vector<16x1xf32> to vector<16x64xf32>
    %62 = arith.subf %58, %61 : vector<16x64xf32>
    %63 = math.exp %62 : vector<16x64xf32>
    %cst_34 = arith.constant dense<0.000000e+00> : vector<16x32xf32>
    %64 = tpu.matmul %63, %54, %cst_34 {dimension_numbers = #tpu.dot_dimension_numbers<[1], [0], [0], [1], [0, 0, 1, 1], [], []>} : vector<16x64xf32>, vector<64x32xf32>, vector<16x32xf32> -> vector<16x32xf32>
    %cst_35 = arith.constant dense<0.000000e+00> : vector<16x32xf32>
    %65 = tpu.matmul %63, %2, %cst_35 {dimension_numbers = #tpu.dot_dimension_numbers<[1], [0], [0], [1], [0, 0, 1, 1], [], []>} : vector<16x64xf32>, vector<64x32xf32>, vector<16x32xf32> -> vector<16x32xf32>
    %66 = tpu.reciprocal %65 : vector<16x32xf32> -> vector<16x32xf32>
    %67 = arith.mulf %64, %66 : vector<16x32xf32>
    %c0_36 = arith.constant 0 : index
    %c0_37 = arith.constant 0 : index
    %c0_38 = arith.constant 0 : index
    %68 = vector.load %arg10[%c0_36, %c0_37, %c0_38] : memref<2x32x32xf32, #tpu.memory_space<vmem>>, vector<1x32x32xf32>
    %69 = vector.shape_cast %68 : vector<1x32x32xf32> to vector<32x32xf32>
    %cst_39 = arith.constant dense<0.000000e+00> : vector<16x32xf32>
    %70 = tpu.matmul %67, %69, %cst_39 {dimension_numbers = #tpu.dot_dimension_numbers<[1], [0], [0], [1], [0, 0, 1, 1], [], []>} : vector<16x32xf32>, vector<32x32xf32>, vector<16x32xf32> -> vector<16x32xf32>
    %c0_40 = arith.constant 0 : index
    %c0_41 = arith.constant 0 : index
    %c0_42 = arith.constant 0 : index
    %71 = vector.load %arg11[%c0_40, %c0_41, %c0_42] : memref<2x1x32xf32, #tpu.memory_space<vmem>>, vector<1x1x32xf32>
    %72 = vector.shape_cast %71 : vector<1x1x32xf32> to vector<1x32xf32>
    %73 = vector.broadcast %72 : vector<1x32xf32> to vector<16x32xf32>
    %74 = arith.addf %70, %73 : vector<16x32xf32>
    %75 = arith.addf %0, %74 : vector<16x32xf32>
    %cst_43 = arith.constant dense<0.000000e+00> : vector<16xf32>
    %76 = vector.multi_reduction <add>, %75, %cst_43 [1] : vector<16x32xf32> to vector<16xf32>
    %77 = vector.shape_cast %76 : vector<16xf32> to vector<16x1xf32>
    %cst_44 = arith.constant 3.200000e+01 : f32
    %78 = vector.broadcast %cst_44 : f32 to vector<16x1xf32>
    %79 = arith.divf %77, %78 : vector<16x1xf32>
    %80 = vector.broadcast %79 : vector<16x1xf32> to vector<16x32xf32>
    %81 = arith.subf %75, %80 : vector<16x32xf32>
    %82 = arith.mulf %81, %81 : vector<16x32xf32>
    %cst_45 = arith.constant dense<0.000000e+00> : vector<16xf32>
    %83 = vector.multi_reduction <add>, %82, %cst_45 [1] : vector<16x32xf32> to vector<16xf32>
    %84 = vector.shape_cast %83 : vector<16xf32> to vector<16x1xf32>
    %cst_46 = arith.constant 0.0322580636 : f32
    %85 = vector.broadcast %cst_46 : f32 to vector<16x1xf32>
    %86 = arith.mulf %84, %85 : vector<16x1xf32>
    %87 = math.sqrt %86 : vector<16x1xf32>
    %cst_47 = arith.constant 9.99999997E-7 : f32
    %88 = vector.broadcast %cst_47 : f32 to vector<16x1xf32>
    %89 = arith.addf %87, %88 : vector<16x1xf32>
    %90 = tpu.reciprocal %89 : vector<16x1xf32> -> vector<16x1xf32>
    %91 = vector.broadcast %5 : f32 to vector<16x1xf32>
    %92 = arith.mulf %91, %90 : vector<16x1xf32>
    %93 = vector.broadcast %79 : vector<16x1xf32> to vector<16x32xf32>
    %94 = arith.subf %75, %93 : vector<16x32xf32>
    %95 = vector.broadcast %92 : vector<16x1xf32> to vector<16x32xf32>
    %96 = arith.mulf %94, %95 : vector<16x32xf32>
    %97 = vector.broadcast %6 : f32 to vector<16x32xf32>
    %98 = arith.addf %96, %97 : vector<16x32xf32>
    %c0_48 = arith.constant 0 : index
    %c0_49 = arith.constant 0 : index
    %c0_50 = arith.constant 0 : index
    %99 = vector.load %arg12[%c0_48, %c0_49, %c0_50] : memref<2x32x64xf32, #tpu.memory_space<vmem>>, vector<1x32x64xf32>
    %100 = vector.shape_cast %99 : vector<1x32x64xf32> to vector<32x64xf32>
    %cst_51 = arith.constant dense<0.000000e+00> : vector<16x64xf32>
    %101 = tpu.matmul %98, %100, %cst_51 {dimension_numbers = #tpu.dot_dimension_numbers<[1], [0], [0], [1], [0, 0, 1, 1], [], []>} : vector<16x32xf32>, vector<32x64xf32>, vector<16x64xf32> -> vector<16x64xf32>
    %c0_52 = arith.constant 0 : index
    %c0_53 = arith.constant 0 : index
    %c0_54 = arith.constant 0 : index
    %102 = vector.load %arg13[%c0_52, %c0_53, %c0_54] : memref<2x1x64xf32, #tpu.memory_space<vmem>>, vector<1x1x64xf32>
    %103 = vector.shape_cast %102 : vector<1x1x64xf32> to vector<1x64xf32>
    %104 = vector.broadcast %103 : vector<1x64xf32> to vector<16x64xf32>
    %105 = arith.addf %101, %104 : vector<16x64xf32>
    %cst_55 = arith.constant 0.000000e+00 : f32
    %106 = vector.broadcast %cst_55 : f32 to vector<16x64xf32>
    %107 = arith.maximumf %105, %106 : vector<16x64xf32>
    %c0_56 = arith.constant 0 : index
    %c0_57 = arith.constant 0 : index
    %c0_58 = arith.constant 0 : index
    %108 = vector.load %arg14[%c0_56, %c0_57, %c0_58] : memref<2x64x32xf32, #tpu.memory_space<vmem>>, vector<1x64x32xf32>
    %109 = vector.shape_cast %108 : vector<1x64x32xf32> to vector<64x32xf32>
    %cst_59 = arith.constant dense<0.000000e+00> : vector<16x32xf32>
    %110 = tpu.matmul %107, %109, %cst_59 {dimension_numbers = #tpu.dot_dimension_numbers<[1], [0], [0], [1], [0, 0, 1, 1], [], []>} : vector<16x64xf32>, vector<64x32xf32>, vector<16x32xf32> -> vector<16x32xf32>
    %c0_60 = arith.constant 0 : index
    %c0_61 = arith.constant 0 : index
    %c0_62 = arith.constant 0 : index
    %111 = vector.load %arg15[%c0_60, %c0_61, %c0_62] : memref<2x1x32xf32, #tpu.memory_space<vmem>>, vector<1x1x32xf32>
    %112 = vector.shape_cast %111 : vector<1x1x32xf32> to vector<1x32xf32>
    %113 = vector.broadcast %112 : vector<1x32xf32> to vector<16x32xf32>
    %114 = arith.addf %110, %113 : vector<16x32xf32>
    %115 = arith.addf %75, %114 : vector<16x32xf32>
    %c4 = arith.constant 4 : index
    %116 = memref.load %arg3[%c4] : memref<10xf32, #tpu.memory_space<smem>>
    %c5 = arith.constant 5 : index
    %117 = memref.load %arg3[%c5] : memref<10xf32, #tpu.memory_space<smem>>
    %c6 = arith.constant 6 : index
    %118 = memref.load %arg3[%c6] : memref<10xf32, #tpu.memory_space<smem>>
    %c7 = arith.constant 7 : index
    %119 = memref.load %arg3[%c7] : memref<10xf32, #tpu.memory_space<smem>>
    %cst_63 = arith.constant dense<0.000000e+00> : vector<16xf32>
    %120 = vector.multi_reduction <add>, %115, %cst_63 [1] : vector<16x32xf32> to vector<16xf32>
    %121 = vector.shape_cast %120 : vector<16xf32> to vector<16x1xf32>
    %cst_64 = arith.constant 3.200000e+01 : f32
    %122 = vector.broadcast %cst_64 : f32 to vector<16x1xf32>
    %123 = arith.divf %121, %122 : vector<16x1xf32>
    %124 = vector.broadcast %123 : vector<16x1xf32> to vector<16x32xf32>
    %125 = arith.subf %115, %124 : vector<16x32xf32>
    %126 = arith.mulf %125, %125 : vector<16x32xf32>
    %cst_65 = arith.constant dense<0.000000e+00> : vector<16xf32>
    %127 = vector.multi_reduction <add>, %126, %cst_65 [1] : vector<16x32xf32> to vector<16xf32>
    %128 = vector.shape_cast %127 : vector<16xf32> to vector<16x1xf32>
    %cst_66 = arith.constant 0.0322580636 : f32
    %129 = vector.broadcast %cst_66 : f32 to vector<16x1xf32>
    %130 = arith.mulf %128, %129 : vector<16x1xf32>
    %131 = math.sqrt %130 : vector<16x1xf32>
    %cst_67 = arith.constant 9.99999997E-7 : f32
    %132 = vector.broadcast %cst_67 : f32 to vector<16x1xf32>
    %133 = arith.addf %131, %132 : vector<16x1xf32>
    %134 = tpu.reciprocal %133 : vector<16x1xf32> -> vector<16x1xf32>
    %135 = vector.broadcast %116 : f32 to vector<16x1xf32>
    %136 = arith.mulf %135, %134 : vector<16x1xf32>
    %137 = vector.broadcast %123 : vector<16x1xf32> to vector<16x32xf32>
    %138 = arith.subf %115, %137 : vector<16x32xf32>
    %139 = vector.broadcast %136 : vector<16x1xf32> to vector<16x32xf32>
    %140 = arith.mulf %138, %139 : vector<16x32xf32>
    %141 = vector.broadcast %117 : f32 to vector<16x32xf32>
    %142 = arith.addf %140, %141 : vector<16x32xf32>
    %c1_68 = arith.constant 1 : index
    %c0_69 = arith.constant 0 : index
    %c0_70 = arith.constant 0 : index
    %143 = vector.load %arg4[%c1_68, %c0_69, %c0_70] : memref<2x32x32xf32, #tpu.memory_space<vmem>>, vector<1x32x32xf32>
    %144 = vector.shape_cast %143 : vector<1x32x32xf32> to vector<32x32xf32>
    %cst_71 = arith.constant dense<0.000000e+00> : vector<16x32xf32>
    %145 = tpu.matmul %142, %144, %cst_71 {dimension_numbers = #tpu.dot_dimension_numbers<[1], [0], [0], [1], [0, 0, 1, 1], [], []>} : vector<16x32xf32>, vector<32x32xf32>, vector<16x32xf32> -> vector<16x32xf32>
    %c1_72 = arith.constant 1 : index
    %c0_73 = arith.constant 0 : index
    %c0_74 = arith.constant 0 : index
    %146 = vector.load %arg5[%c1_72, %c0_73, %c0_74] : memref<2x1x32xf32, #tpu.memory_space<vmem>>, vector<1x1x32xf32>
    %147 = vector.shape_cast %146 : vector<1x1x32xf32> to vector<1x32xf32>
    %148 = vector.broadcast %147 : vector<1x32xf32> to vector<16x32xf32>
    %149 = arith.addf %145, %148 : vector<16x32xf32>
    %c1_75 = arith.constant 1 : index
    %c0_76 = arith.constant 0 : index
    %c0_77 = arith.constant 0 : index
    %150 = vector.load %arg6[%c1_75, %c0_76, %c0_77] : memref<2x32x32xf32, #tpu.memory_space<vmem>>, vector<1x32x32xf32>
    %151 = vector.shape_cast %150 : vector<1x32x32xf32> to vector<32x32xf32>
    %cst_78 = arith.constant dense<0.000000e+00> : vector<16x32xf32>
    %152 = tpu.matmul %142, %151, %cst_78 {dimension_numbers = #tpu.dot_dimension_numbers<[1], [0], [0], [1], [0, 0, 1, 1], [], []>} : vector<16x32xf32>, vector<32x32xf32>, vector<16x32xf32> -> vector<16x32xf32>
    %c1_79 = arith.constant 1 : index
    %c0_80 = arith.constant 0 : index
    %c0_81 = arith.constant 0 : index
    %153 = vector.load %arg7[%c1_79, %c0_80, %c0_81] : memref<2x1x32xf32, #tpu.memory_space<vmem>>, vector<1x1x32xf32>
    %154 = vector.shape_cast %153 : vector<1x1x32xf32> to vector<1x32xf32>
    %155 = vector.broadcast %154 : vector<1x32xf32> to vector<16x32xf32>
    %156 = arith.addf %152, %155 : vector<16x32xf32>
    %c1_82 = arith.constant 1 : index
    %c0_83 = arith.constant 0 : index
    %c0_84 = arith.constant 0 : index
    %157 = vector.load %arg8[%c1_82, %c0_83, %c0_84] : memref<2x32x32xf32, #tpu.memory_space<vmem>>, vector<1x32x32xf32>
    %158 = vector.shape_cast %157 : vector<1x32x32xf32> to vector<32x32xf32>
    %cst_85 = arith.constant dense<0.000000e+00> : vector<16x32xf32>
    %159 = tpu.matmul %142, %158, %cst_85 {dimension_numbers = #tpu.dot_dimension_numbers<[1], [0], [0], [1], [0, 0, 1, 1], [], []>} : vector<16x32xf32>, vector<32x32xf32>, vector<16x32xf32> -> vector<16x32xf32>
    %c1_86 = arith.constant 1 : index
    %c0_87 = arith.constant 0 : index
    %c0_88 = arith.constant 0 : index
    %160 = vector.load %arg9[%c1_86, %c0_87, %c0_88] : memref<2x1x32xf32, #tpu.memory_space<vmem>>, vector<1x1x32xf32>
    %161 = vector.shape_cast %160 : vector<1x1x32xf32> to vector<1x32xf32>
    %162 = vector.broadcast %161 : vector<1x32xf32> to vector<16x32xf32>
    %163 = arith.addf %159, %162 : vector<16x32xf32>
    %164 = tpu.concatenate %156, %156, %156, %156 in 0 : vector<16x32xf32>, vector<16x32xf32>, vector<16x32xf32>, vector<16x32xf32> -> vector<64x32xf32>
    %165 = arith.mulf %164, %2 : vector<64x32xf32>
    %166 = tpu.concatenate %163, %163, %163, %163 in 0 : vector<16x32xf32>, vector<16x32xf32>, vector<16x32xf32>, vector<16x32xf32> -> vector<64x32xf32>
    %167 = arith.mulf %166, %2 : vector<64x32xf32>
    %cst_89 = arith.constant dense<0.000000e+00> : vector<16x64xf32>
    %168 = tpu.matmul %149, %165, %cst_89 {dimension_numbers = #tpu.dot_dimension_numbers<[1], [1], [0], [0], [0, 0, 1, 0], [], []>} : vector<16x32xf32>, vector<64x32xf32>, vector<16x64xf32> -> vector<16x64xf32>
    %cst_90 = arith.constant 0.353553385 : f32
    %169 = vector.broadcast %cst_90 : f32 to vector<16x64xf32>
    %170 = arith.mulf %168, %169 : vector<16x64xf32>
    %171 = arith.addf %170, %1 : vector<16x64xf32>
    %cst_91 = arith.constant dense<0xFF800000> : vector<16xf32>
    %172 = vector.multi_reduction <maximumf>, %171, %cst_91 [1] : vector<16x64xf32> to vector<16xf32>
    %173 = vector.shape_cast %172 : vector<16xf32> to vector<16x1xf32>
    %174 = vector.broadcast %173 : vector<16x1xf32> to vector<16x64xf32>
    %175 = arith.subf %171, %174 : vector<16x64xf32>
    %176 = math.exp %175 : vector<16x64xf32>
    %cst_92 = arith.constant dense<0.000000e+00> : vector<16x32xf32>
    %177 = tpu.matmul %176, %167, %cst_92 {dimension_numbers = #tpu.dot_dimension_numbers<[1], [0], [0], [1], [0, 0, 1, 1], [], []>} : vector<16x64xf32>, vector<64x32xf32>, vector<16x32xf32> -> vector<16x32xf32>
    %cst_93 = arith.constant dense<0.000000e+00> : vector<16x32xf32>
    %178 = tpu.matmul %176, %2, %cst_93 {dimension_numbers = #tpu.dot_dimension_numbers<[1], [0], [0], [1], [0, 0, 1, 1], [], []>} : vector<16x64xf32>, vector<64x32xf32>, vector<16x32xf32> -> vector<16x32xf32>
    %179 = tpu.reciprocal %178 : vector<16x32xf32> -> vector<16x32xf32>
    %180 = arith.mulf %177, %179 : vector<16x32xf32>
    %c1_94 = arith.constant 1 : index
    %c0_95 = arith.constant 0 : index
    %c0_96 = arith.constant 0 : index
    %181 = vector.load %arg10[%c1_94, %c0_95, %c0_96] : memref<2x32x32xf32, #tpu.memory_space<vmem>>, vector<1x32x32xf32>
    %182 = vector.shape_cast %181 : vector<1x32x32xf32> to vector<32x32xf32>
    %cst_97 = arith.constant dense<0.000000e+00> : vector<16x32xf32>
    %183 = tpu.matmul %180, %182, %cst_97 {dimension_numbers = #tpu.dot_dimension_numbers<[1], [0], [0], [1], [0, 0, 1, 1], [], []>} : vector<16x32xf32>, vector<32x32xf32>, vector<16x32xf32> -> vector<16x32xf32>
    %c1_98 = arith.constant 1 : index
    %c0_99 = arith.constant 0 : index
    %c0_100 = arith.constant 0 : index
    %184 = vector.load %arg11[%c1_98, %c0_99, %c0_100] : memref<2x1x32xf32, #tpu.memory_space<vmem>>, vector<1x1x32xf32>
    %185 = vector.shape_cast %184 : vector<1x1x32xf32> to vector<1x32xf32>
    %186 = vector.broadcast %185 : vector<1x32xf32> to vector<16x32xf32>
    %187 = arith.addf %183, %186 : vector<16x32xf32>
    %188 = arith.addf %115, %187 : vector<16x32xf32>
    %cst_101 = arith.constant dense<0.000000e+00> : vector<16xf32>
    %189 = vector.multi_reduction <add>, %188, %cst_101 [1] : vector<16x32xf32> to vector<16xf32>
    %190 = vector.shape_cast %189 : vector<16xf32> to vector<16x1xf32>
    %cst_102 = arith.constant 3.200000e+01 : f32
    %191 = vector.broadcast %cst_102 : f32 to vector<16x1xf32>
    %192 = arith.divf %190, %191 : vector<16x1xf32>
    %193 = vector.broadcast %192 : vector<16x1xf32> to vector<16x32xf32>
    %194 = arith.subf %188, %193 : vector<16x32xf32>
    %195 = arith.mulf %194, %194 : vector<16x32xf32>
    %cst_103 = arith.constant dense<0.000000e+00> : vector<16xf32>
    %196 = vector.multi_reduction <add>, %195, %cst_103 [1] : vector<16x32xf32> to vector<16xf32>
    %197 = vector.shape_cast %196 : vector<16xf32> to vector<16x1xf32>
    %cst_104 = arith.constant 0.0322580636 : f32
    %198 = vector.broadcast %cst_104 : f32 to vector<16x1xf32>
    %199 = arith.mulf %197, %198 : vector<16x1xf32>
    %200 = math.sqrt %199 : vector<16x1xf32>
    %cst_105 = arith.constant 9.99999997E-7 : f32
    %201 = vector.broadcast %cst_105 : f32 to vector<16x1xf32>
    %202 = arith.addf %200, %201 : vector<16x1xf32>
    %203 = tpu.reciprocal %202 : vector<16x1xf32> -> vector<16x1xf32>
    %204 = vector.broadcast %118 : f32 to vector<16x1xf32>
    %205 = arith.mulf %204, %203 : vector<16x1xf32>
    %206 = vector.broadcast %192 : vector<16x1xf32> to vector<16x32xf32>
    %207 = arith.subf %188, %206 : vector<16x32xf32>
    %208 = vector.broadcast %205 : vector<16x1xf32> to vector<16x32xf32>
    %209 = arith.mulf %207, %208 : vector<16x32xf32>
    %210 = vector.broadcast %119 : f32 to vector<16x32xf32>
    %211 = arith.addf %209, %210 : vector<16x32xf32>
    %c1_106 = arith.constant 1 : index
    %c0_107 = arith.constant 0 : index
    %c0_108 = arith.constant 0 : index
    %212 = vector.load %arg12[%c1_106, %c0_107, %c0_108] : memref<2x32x64xf32, #tpu.memory_space<vmem>>, vector<1x32x64xf32>
    %213 = vector.shape_cast %212 : vector<1x32x64xf32> to vector<32x64xf32>
    %cst_109 = arith.constant dense<0.000000e+00> : vector<16x64xf32>
    %214 = tpu.matmul %211, %213, %cst_109 {dimension_numbers = #tpu.dot_dimension_numbers<[1], [0], [0], [1], [0, 0, 1, 1], [], []>} : vector<16x32xf32>, vector<32x64xf32>, vector<16x64xf32> -> vector<16x64xf32>
    %c1_110 = arith.constant 1 : index
    %c0_111 = arith.constant 0 : index
    %c0_112 = arith.constant 0 : index
    %215 = vector.load %arg13[%c1_110, %c0_111, %c0_112] : memref<2x1x64xf32, #tpu.memory_space<vmem>>, vector<1x1x64xf32>
    %216 = vector.shape_cast %215 : vector<1x1x64xf32> to vector<1x64xf32>
    %217 = vector.broadcast %216 : vector<1x64xf32> to vector<16x64xf32>
    %218 = arith.addf %214, %217 : vector<16x64xf32>
    %cst_113 = arith.constant 0.000000e+00 : f32
    %219 = vector.broadcast %cst_113 : f32 to vector<16x64xf32>
    %220 = arith.maximumf %218, %219 : vector<16x64xf32>
    %c1_114 = arith.constant 1 : index
    %c0_115 = arith.constant 0 : index
    %c0_116 = arith.constant 0 : index
    %221 = vector.load %arg14[%c1_114, %c0_115, %c0_116] : memref<2x64x32xf32, #tpu.memory_space<vmem>>, vector<1x64x32xf32>
    %222 = vector.shape_cast %221 : vector<1x64x32xf32> to vector<64x32xf32>
    %cst_117 = arith.constant dense<0.000000e+00> : vector<16x32xf32>
    %223 = tpu.matmul %220, %222, %cst_117 {dimension_numbers = #tpu.dot_dimension_numbers<[1], [0], [0], [1], [0, 0, 1, 1], [], []>} : vector<16x64xf32>, vector<64x32xf32>, vector<16x32xf32> -> vector<16x32xf32>
    %c1_118 = arith.constant 1 : index
    %c0_119 = arith.constant 0 : index
    %c0_120 = arith.constant 0 : index
    %224 = vector.load %arg15[%c1_118, %c0_119, %c0_120] : memref<2x1x32xf32, #tpu.memory_space<vmem>>, vector<1x1x32xf32>
    %225 = vector.shape_cast %224 : vector<1x1x32xf32> to vector<1x32xf32>
    %226 = vector.broadcast %225 : vector<1x32xf32> to vector<16x32xf32>
    %227 = arith.addf %223, %226 : vector<16x32xf32>
    %228 = arith.addf %188, %227 : vector<16x32xf32>
    %c8 = arith.constant 8 : index
    %229 = memref.load %arg3[%c8] : memref<10xf32, #tpu.memory_space<smem>>
    %c9 = arith.constant 9 : index
    %230 = memref.load %arg3[%c9] : memref<10xf32, #tpu.memory_space<smem>>
    %cst_121 = arith.constant dense<0.000000e+00> : vector<16xf32>
    %231 = vector.multi_reduction <add>, %228, %cst_121 [1] : vector<16x32xf32> to vector<16xf32>
    %232 = vector.shape_cast %231 : vector<16xf32> to vector<16x1xf32>
    %cst_122 = arith.constant 3.200000e+01 : f32
    %233 = vector.broadcast %cst_122 : f32 to vector<16x1xf32>
    %234 = arith.divf %232, %233 : vector<16x1xf32>
    %235 = vector.broadcast %234 : vector<16x1xf32> to vector<16x32xf32>
    %236 = arith.subf %228, %235 : vector<16x32xf32>
    %237 = arith.mulf %236, %236 : vector<16x32xf32>
    %cst_123 = arith.constant dense<0.000000e+00> : vector<16xf32>
    %238 = vector.multi_reduction <add>, %237, %cst_123 [1] : vector<16x32xf32> to vector<16xf32>
    %239 = vector.shape_cast %238 : vector<16xf32> to vector<16x1xf32>
    %cst_124 = arith.constant 0.0322580636 : f32
    %240 = vector.broadcast %cst_124 : f32 to vector<16x1xf32>
    %241 = arith.mulf %239, %240 : vector<16x1xf32>
    %242 = math.sqrt %241 : vector<16x1xf32>
    %cst_125 = arith.constant 9.99999997E-7 : f32
    %243 = vector.broadcast %cst_125 : f32 to vector<16x1xf32>
    %244 = arith.addf %242, %243 : vector<16x1xf32>
    %245 = tpu.reciprocal %244 : vector<16x1xf32> -> vector<16x1xf32>
    %246 = vector.broadcast %229 : f32 to vector<16x1xf32>
    %247 = arith.mulf %246, %245 : vector<16x1xf32>
    %248 = vector.broadcast %234 : vector<16x1xf32> to vector<16x32xf32>
    %249 = arith.subf %228, %248 : vector<16x32xf32>
    %250 = vector.broadcast %247 : vector<16x1xf32> to vector<16x32xf32>
    %251 = arith.mulf %249, %250 : vector<16x32xf32>
    %252 = vector.broadcast %230 : f32 to vector<16x32xf32>
    %253 = arith.addf %251, %252 : vector<16x32xf32>
    %c0_126 = arith.constant 0 : index
    %c0_127 = arith.constant 0 : index
    %254 = vector.load %arg16[%c0_126, %c0_127] : memref<16x32xf32, #tpu.memory_space<vmem>>, vector<16x32xf32>
    tpu.vector_store %arg16[%c0_126, %c0_127], %253 {strides = array<i32>} : memref<16x32xf32, #tpu.memory_space<vmem>>, vector<16x32xf32>,
    return
  }
}

</mosaic_0001>

<bundles_post_ra>
// kernel: eq.25
= control target key start
LH: loop header
LB: loop body
LE: loop exit
PB: predicated region body
PF: predicated region fallthrough
CT: control target
= control target key end

     0   :  { %vm7_vm0 = vcmask 64512   ;;  %s37_s8 = smov 8   ;;  %s38_s9 = smov 16   ;;  %vm13_vm1 = vcmask 261312   ;;  %vm19_vm2 = vcmask 195712   ;;  %vm25_vm3 = vcmask 130112   ;;  %s55_s0 = inlined_call_operand.vmem [shape: s32[4,8], index: 0, kind: input, shape index: {}]   ;;  %s56_s1 = inlined_call_operand.vmem [shape: s32[32], index: 1, kind: output, shape index: {}]  }
   0x1   :  { %v4_v0 = vld [vmem:[%s55_s0] sm:$0xf]  ;;  %s36_s0 = smov 24  }
   0x2   :  { %5 = vst [vmem:[#allocation1] sm:$0xf] %v4_v0 }
   0x9   :  { %v10_v1 = vld [vmem:[#allocation1 + $0x3] sm:$0x1]   ;;  %v22_v2 = vld [vmem:[#allocation1 + $0x1] sm:$0x1]   ;;  %v6_v3 = vld [vmem:[#allocation1] sm:$0x1]  }
   0xa   :  { %11 = vrot.lane.b32.xlu0 %v10_v1, %s36_s0  ;;  %23 = vrot.lane.b32.xlu1 %v22_v2, %s37_s8  ;;  %v16_v4 = vld [vmem:[#allocation1 + $0x2] sm:$0x1]   ;;  %8 = vst.msk [vmem:[#allocation0] sm:$0x1] %vm7_vm0, %v6_v3  }
   0xe   :  { %17 = vrot.lane.b32.xlu0 %v16_v4, %s38_s9 }
  0x7c   :  { %v12_v5 = vpop.permute.xlu0 %11   ;;  %v24_v6 = vpop.permute.xlu1 %23  }
  0x7d   :  { %14 = vst.msk [vmem:[#allocation0] sm:$0x1] %vm13_vm1, %v12_v5  }
  0x80   :  { %v18_v7 = vpop.permute.xlu0 %17  }
  0x81   :  { %20 = vst.msk [vmem:[#allocation0] sm:$0x1] %vm19_vm2, %v18_v7  }
  0x82   :  { %26 = vst.msk [vmem:[#allocation0] sm:$0x1] %vm25_vm3, %v24_v6  }
  0x89   :  { %v30_v8 = vld [vmem:[#allocation0] sm:$0x1] }
  0x8a   :  { %32 = vst [vmem:[%s56_s1] sm:$0x1] %v30_v8 }

// kernel: eq.22
= control target key start
LH: loop header
LB: loop body
LE: loop exit
PB: predicated region body
PF: predicated region fallthrough
CT: control target
= control target key end

     0   :  { %vm7_vm0 = vcmask 130048   ;;  %s37_s8 = smov 16   ;;  %s38_s9 = smov 32   ;;  %vm13_vm1 = vcmask 523648   ;;  %vm19_vm2 = vcmask 392448   ;;  %vm25_vm3 = vcmask 261248   ;;  %s55_s0 = inlined_call_operand.vmem [shape: s32[4,16], index: 0, kind: input, shape index: {}]   ;;  %s56_s1 = inlined_call_operand.vmem [shape: s32[64], index: 1, kind: output, shape index: {}]  }
   0x1   :  { %v4_v0 = vld [vmem:[%s55_s0] sm:$0xf]  ;;  %s36_s0 = smov 48  }
   0x2   :  { %5 = vst [vmem:[#allocation1] sm:$0xf] %v4_v0 }
   0x9   :  { %v10_v1 = vld [vmem:[#allocation1 + $0x3] sm:$0x1]   ;;  %v22_v2 = vld [vmem:[#allocation1 + $0x1] sm:$0x1]   ;;  %v6_v3 = vld [vmem:[#allocation1] sm:$0x1]  }
   0xa   :  { %11 = vrot.lane.b32.xlu0 %v10_v1, %s36_s0  ;;  %23 = vrot.lane.b32.xlu1 %v22_v2, %s37_s8  ;;  %v16_v4 = vld [vmem:[#allocation1 + $0x2] sm:$0x1]   ;;  %8 = vst.msk [vmem:[#allocation0] sm:$0x1] %vm7_vm0, %v6_v3  }
   0xe   :  { %17 = vrot.lane.b32.xlu0 %v16_v4, %s38_s9 }
  0x7c   :  { %v12_v5 = vpop.permute.xlu0 %11   ;;  %v24_v6 = vpop.permute.xlu1 %23  }
  0x7d   :  { %14 = vst.msk [vmem:[#allocation0] sm:$0x1] %vm13_vm1, %v12_v5  }
  0x80   :  { %v18_v7 = vpop.permute.xlu0 %17  }
  0x81   :  { %20 = vst.msk [vmem:[#allocation0] sm:$0x1] %vm19_vm2, %v18_v7  }
  0x82   :  { %26 = vst.msk [vmem:[#allocation0] sm:$0x1] %vm25_vm3, %v24_v6  }
  0x89   :  { %v30_v8 = vld [vmem:[#allocation0] sm:$0x1] }
  0x8a   :  { %32 = vst [vmem:[%s56_s1] sm:$0x1] %v30_v8 }

// kernel: tile.9
= control target key start
LH: loop header
LB: loop body
LE: loop exit
PB: predicated region body
PF: predicated region fallthrough
CT: control target
= control target key end

     0   :  { %vm82_vm0 = vcmask 1047556   ;;  %vm84_vm1 = vcmask 130048   ;;  %s195_s9 = smov 48   ;;  %s196_s14 = smov 16   ;;  %vm103_vm2 = vcmask 523648   ;;  %vm124_vm3 = vcmask 392448   ;;  %s289_s0 = inlined_call_operand.vmem [shape: f32[16,4,16], index: 0, kind: input, shape index: {}]   ;;  %s290_s1 = inlined_call_operand.vmem [shape: f32[16,64], index: 1, kind: output, shape index: {}]  }
   0x1   :  { %v180_v0 = vld [vmem:[%s289_s0 + $0x1c] sm:$0xf]  ;;  %v181_v1 = vld [vmem:[%s289_s0 + $0x18] sm:$0xf]  ;;  %v182_v2 = vld [vmem:[%s289_s0 + $0x14] sm:$0xf] }
   0x2   :  { %48 = vst [vmem:[#allocation0 + $0x38] sm:$0xf] %v180_v0  ;;  %53 = vst [vmem:[#allocation0 + $0x30] sm:$0xf] %v181_v1  ;;  %v183_v3 = vld [vmem:[%s289_s0 + $0x10] sm:$0xf] }
   0x3   :  { %58 = vst [vmem:[#allocation0 + $0x28] sm:$0xf] %v182_v2  ;;  %v184_v4 = vld [vmem:[%s289_s0 + $0xc] sm:$0xf]  ;;  %v185_v5 = vld [vmem:[%s289_s0 + $0x8] sm:$0xf] }
   0x4   :  { %63 = vst [vmem:[#allocation0 + $0x20] sm:$0xf] %v183_v3  ;;  %68 = vst [vmem:[#allocation0 + $0x18] sm:$0xf] %v184_v4  ;;  %v186_v6 = vld [vmem:[%s289_s0 + $0x4] sm:$0xf] }
   0x5   :  { %73 = vst [vmem:[#allocation0 + $0x10] sm:$0xf] %v185_v5  ;;  %v78_v7 = vld [vmem:[%s289_s0] sm:$0xf]  ;;  %77 = vst [vmem:[#allocation0 + $0x8] sm:$0xf] %v186_v6 }
   0x6   :  { %79 = vst [vmem:[#allocation0] sm:$0xf] %v78_v7  ;;  %v172_v8 = vld [vmem:[%s289_s0 + $0x3c] sm:$0xf]  ;;  %v173_v9 = vld [vmem:[%s289_s0 + $0x38] sm:$0xf] }
   0x7   :  { %8 = vst [vmem:[#allocation0 + $0x78] sm:$0xf] %v172_v8  ;;  %13 = vst [vmem:[#allocation0 + $0x70] sm:$0xf] %v173_v9  ;;  %v174_v10 = vld [vmem:[%s289_s0 + $0x34] sm:$0xf] }
   0x8   :  { %v175_v11 = vld [vmem:[%s289_s0 + $0x30] sm:$0xf]  ;;  %v176_v12 = vld [vmem:[%s289_s0 + $0x2c] sm:$0xf]  ;;  %18 = vst [vmem:[#allocation0 + $0x68] sm:$0xf] %v174_v10 }
   0x9   :  { %23 = vst [vmem:[#allocation0 + $0x60] sm:$0xf] %v175_v11  ;;  %28 = vst [vmem:[#allocation0 + $0x58] sm:$0xf] %v176_v12  ;;  %v177_v13 = vld [vmem:[%s289_s0 + $0x28] sm:$0xf] }
   0xa   :  { %v178_v14 = vld [vmem:[%s289_s0 + $0x24] sm:$0xf]  ;;  %v179_v15 = vld [vmem:[%s289_s0 + $0x20] sm:$0xf]  ;;  %33 = vst [vmem:[#allocation0 + $0x50] sm:$0xf] %v177_v13 }
   0xb   :  { %38 = vst [vmem:[#allocation0 + $0x48] sm:$0xf] %v178_v14  ;;  %43 = vst [vmem:[#allocation0 + $0x40] sm:$0xf] %v179_v15  ;;  %s194_s0 = smov 32   ;;  %vm145_vm4 = vcmask 261248  }
   0xc   :  { %v119_v16 = vld [vmem:[#allocation0 + $0x2] ss:$8 sm:$0xf0]   ;;  %v98_v17 = vld [vmem:[#allocation0 + $0x3] ss:$8 sm:$0xf0]  }
   0xd   :  { %v117_v18 = vld [vmem:[#allocation0 + $0x2] ss:$8 sm:$0xf]   ;;  %v96_v19 = vld [vmem:[#allocation0 + $0x3] ss:$8 sm:$0xf]  }
   0xe   :  { %v121_v20 = vsel %vm82_vm0, %v119_v16, %v117_v18  ;;  %v100_v21 = vsel %vm82_vm0, %v98_v17, %v96_v19  ;;  %v138_v24 = vld [vmem:[#allocation0 + $0x1] ss:$8 sm:$0xf]   ;;  %v80_v32 = vld [vmem:[#allocation0] ss:$8 sm:$0xf]  }
   0xf   :  { %122 = vrot.lane.b32.xlu1 %v121_v20, %s194_s0  ;;  %101 = vrot.lane.b32.xlu0 %v100_v21, %s195_s9  ;;  %v140_v25 = vld [vmem:[#allocation0 + $0x1] ss:$8 sm:$0xf0]   ;;  %v81_v33 = vld [vmem:[#allocation0] ss:$8 sm:$0xf0]  }
  0x10   :  { %v129_v22 = vld [vmem:[#allocation0 + $0x42] ss:$8 sm:$0xf0]   ;;  %v108_v23 = vld [vmem:[#allocation0 + $0x43] ss:$8 sm:$0xf0]   ;;  %v83_v34 = vsel %vm82_vm0, %v81_v33, %v80_v32  ;;  %v142_v38 = vsel %vm82_vm0, %v140_v25, %v138_v24 }
  0x11   :  { %v150_v31 = vld [vmem:[#allocation0 + $0x41] ss:$8 sm:$0xf0]   ;;  %v89_v36 = vld [vmem:[#allocation0 + $0x40] ss:$8 sm:$0xf0]  }
  0x12   :  { %v127_v26 = vld [vmem:[#allocation0 + $0x42] ss:$8 sm:$0xf]   ;;  %v106_v27 = vld [vmem:[#allocation0 + $0x43] ss:$8 sm:$0xf]  }
  0x13   :  { %v131_v28 = vsel %vm82_vm0, %v129_v22, %v127_v26  ;;  %v110_v29 = vsel %vm82_vm0, %v108_v23, %v106_v27  ;;  %v148_v30 = vld [vmem:[#allocation0 + $0x41] ss:$8 sm:$0xf]   ;;  %v87_v35 = vld [vmem:[#allocation0 + $0x40] ss:$8 sm:$0xf]  }
  0x14   :  { %132 = vrot.lane.b32.xlu1 %v131_v28, %s194_s0  ;;  %111 = vrot.lane.b32.xlu0 %v110_v29, %s195_s9  ;;  %v152_v37 = vsel %vm82_vm0, %v150_v31, %v148_v30  ;;  %85 = vst.msk [vmem:[%s290_s1] sm:$0xff] %vm84_vm1, %v83_v34   ;;  %v91_v39 = vsel %vm82_vm0, %v89_v36, %v87_v35 }
  0x15   :  { %187 = vst.msk [vmem:[%s290_s1 + $0x8] sm:$0xff] %vm84_vm1, %v91_v39  }
  0x18   :  { %153 = vrot.lane.b32.xlu1 %v152_v37, %s196_s14  ;;  %143 = vrot.lane.b32.xlu0 %v142_v38, %s196_s14 }
  0x81   :  { %v123_v40 = vpop.permute.xlu1 %122   ;;  %v102_v41 = vpop.permute.xlu0 %101  }
  0x82   :  { %104 = vst.msk [vmem:[%s290_s1] sm:$0xff] %vm103_vm2, %v102_v41  }
  0x83   :  { %125 = vst.msk [vmem:[%s290_s1] sm:$0xff] %vm124_vm3, %v123_v40  }
  0x86   :  { %v133_v42 = vpop.permute.xlu1 %132   ;;  %v112_v43 = vpop.permute.xlu0 %111  }
  0x87   :  { %188 = vst.msk [vmem:[%s290_s1 + $0x8] sm:$0xff] %vm103_vm2, %v112_v43  }
  0x88   :  { %189 = vst.msk [vmem:[%s290_s1 + $0x8] sm:$0xff] %vm124_vm3, %v133_v42  }
  0x8a   :  { %v154_v44 = vpop.permute.xlu1 %153   ;;  %v144_v45 = vpop.permute.xlu0 %143  }
  0x8b   :  { %190 = vst.msk [vmem:[%s290_s1 + $0x8] sm:$0xff] %vm145_vm4, %v154_v44   ;;  %146 = vst.msk [vmem:[%s290_s1] sm:$0xff] %vm145_vm4, %v144_v45  }

// kernel: encoder_forward.1
= control target key start
LH: loop header
LB: loop body
LE: loop exit
PB: predicated region body
PF: predicated region fallthrough
CT: control target
= control target key end

     0   :  { %s3494_s0 = inlined_call_operand.vmem [shape: f32[16,32], index: 0, kind: input, shape index: {}]   ;;  %s3495_s1 = inlined_call_operand.vmem [shape: f32[16,64], index: 1, kind: input, shape index: {}]   ;;  %s3496_s2 = inlined_call_operand.vmem [shape: f32[64,32], index: 2, kind: input, shape index: {}]   ;;  %s3497_s3 = inlined_call_operand.vmem [shape: f32[10], index: 3, kind: input, shape index: {}]   ;;  %s3498_s4 = inlined_call_operand.vmem [shape: f32[2,32,32], index: 4, kind: input, shape index: {}]   ;;  %s3499_s5 = inlined_call_operand.vmem [shape: f32[2,1,32], index: 5, kind: input, shape index: {}]   ;;  %s3500_s6 = inlined_call_operand.vmem [shape: f32[2,32,32], index: 6, kind: input, shape index: {}]   ;;  %s3501_s7 = inlined_call_operand.vmem [shape: f32[2,1,32], index: 7, kind: input, shape index: {}]   ;;  %s3502_s8 = inlined_call_operand.vmem [shape: f32[2,32,32], index: 8, kind: input, shape index: {}]   ;;  %s3503_s9 = inlined_call_operand.vmem [shape: f32[2,1,32], index: 9, kind: input, shape index: {}]   ;;  %s3504_s10 = inlined_call_operand.vmem [shape: f32[2,32,32], index: 10, kind: input, shape index: {}]   ;;  %s3505_s11 = inlined_call_operand.vmem [shape: f32[2,1,32], index: 11, kind: input, shape index: {}]   ;;  %s3506_s12 = inlined_call_operand.vmem [shape: f32[2,32,64], index: 12, kind: input, shape index: {}]   ;;  %s3507_s13 = inlined_call_operand.vmem [shape: f32[2,1,64], index: 13, kind: input, shape index: {}]   ;;  %s3508_s14 = inlined_call_operand.vmem [shape: f32[2,64,32], index: 14, kind: input, shape index: {}]   ;;  %s3509_s15 = inlined_call_operand.vmem [shape: f32[2,1,32], index: 15, kind: input, shape index: {}]   ;;  %s3510_s16 = inlined_call_operand.hbm [shape: f32[16,32], index: 16, kind: output, shape index: {}]  }
   0x1   :  { %3512 = sst [smem:[#allocation8_spill]] %s3494_s0 }
   0x2   :  { %21 = vsyncpa [#allocation4], 0 }
   0x3   :  { %22 = vsyncpa [#allocation3], 0  ;;  %s35_s23 = sshll.u32 %s3497_s3, 4  ;;  %s36_s23 = int_to_ptr.vmem [resolvable:$true] %s35_s23 }
   0x4   :  { %s2840_s24 = scalar_lea.vmem %s36_s23, 16  ;;  %p2845_p1 = scmp.lt.s32.totalorder %s36_s23, %s36_s23 }
   0x5   :  { %p2841_p0 = scmp.ne.s32.totalorder %s36_s23, %s2840_s24  ;;  %p2846_p2 = scmp.lt.s32.totalorder %s2840_s24, %s2840_s24 }
   0x7   :  { %p2847_p3 = por %p2846_p2, %p2845_p1 }
   0x9   :  { %p2848_p4 = pnand %p2847_p3, %p2841_p0 }
   0xb   :  { %2851 = shalt.err (!%p2848_p4)
}
   0xc   :  { %s2878_s25 = smov [#allocation2]  }
   0xd   :  { %38 = dma.vmem_to_smem %s36_s23, 16, %s2878_s25, [#allocation4]  }
   0xe   :  { %2874 = dma.done.wait [#allocation4], 16  }
   0xf   :  { %2875 = vsyncadd [#allocation4], 4294967280 }
  0x10   :  { %66 = sfence }
  0x11   :  { %s3513_s28 = sld [smem:[#allocation8_spill]]  ;;  %vm83_vm0 = vcmask 261120   ;;  %v131_v14 = vld [vmem:[%s3498_s4] sm:$0xff]  ;;  %v132_v15 = vld [vmem:[%s3498_s4 + $0x8] sm:$0xff]  ;;  %v133_v19 = vld [vmem:[%s3498_s4 + $0x10] sm:$0xff]  ;;  %s79_s19 = sld [smem:[#allocation2]] }
  0x12   :  { %v309_v16 = vld [vmem:[%s3502_s8] sm:$0xff]  ;;  %v2556_v17 = vpack.c.bf16 %v132_v15, %v131_v14  ;;  %v310_v18 = vld [vmem:[%s3502_s8 + $0x8] sm:$0xff]  ;;  %v134_v20 = vld [vmem:[%s3498_s4 + $0x18] sm:$0xff]  ;;  %s2047_s20 = sld [smem:[#allocation2 + $0x1]]  ;;  %vm520_vm6 = vcmask 523264   ;;  %s2049_s3 = sld [smem:[#allocation2 + $0x3]] }
  0x13   :  { %v2572_v21 = vpack.c.bf16 %v310_v18, %v309_v16  ;;  %v2560_v22 = vpack.c.bf16 %v134_v20, %v133_v19  ;;  %v311_v23 = vld [vmem:[%s3502_s8 + $0x10] sm:$0xff]  ;;  %v312_v24 = vld [vmem:[%s3502_s8 + $0x18] sm:$0xff]  ;;  %v223_v26 = vld [vmem:[%s3500_s6] sm:$0xff]  ;;  %s2083_s22 = sld [smem:[#allocation2 + $0x5]]  ;;  %s2084_s30 = sld [smem:[#allocation2 + $0x6]] }
  0x14   :  { %2557 = vmatprep.subr.bf16.mxu1 %v2556_v17  ;;  %v2576_v25 = vpack.c.bf16 %v312_v24, %v311_v23  ;;  %v224_v27 = vld [vmem:[%s3500_s6 + $0x8] sm:$0xff]  ;;  %v225_v53 = vld [vmem:[%s3500_s6 + $0x10] sm:$0xff]  ;;  %v226_v54 = vld [vmem:[%s3500_s6 + $0x18] sm:$0xff]  ;;  %s2085_s0 = sld [smem:[#allocation2 + $0x7]] }
  0x15   :  { %2559 = vmatpush3.bf16.msra.mxu1 %v2556_v17  ;;  %2573 = vmatprep.subr.bf16.mxu0 %v2572_v21  ;;  %v2564_v28 = vpack.c.bf16 %v224_v27, %v223_v26  ;;  %v2568_v57 = vpack.c.bf16 %v226_v54, %v225_v53  ;;  %v2056_v58 = vld [vmem:[%s3503_s9] ss:$0 sm:$0xff]  ;;  %v3051_v60 = vld [vmem:[%s3496_s2 + $0x8] sm:$0xff]  ;;  %v3056_v61 = vld [vmem:[%s3496_s2 + $0x18] sm:$0xff] }
  0x16   :  { %2575 = vmatpush3.bf16.msra.mxu0 %v2572_v21  ;;  %2561 = vmatprep.subr.bf16.mxu1 %v2560_v22  ;;  %v3046_v59 = vld [vmem:[%s3499_s5] ss:$0 sm:$0xff]  ;;  %vm3111_vm5 = vmpackc.low %vm83_vm0, %vm83_vm0 }
  0x17   :  { %v2973_v0 = vld [vmem:[%s3513_s28] sm:$0xff]  ;;  %v2978_v1 = vld [vmem:[%s3513_s28 + $0x8] sm:$0xff]  ;;  %2577 = vmatprep.subr.bf16.mxu0 %v2576_v25  ;;  %v123_v45 = vstv %s79_s19 }
  0x18   :  { %v84_v2 = vsel %vm83_vm0, %v2973_v0, 0.0  ;;  %v87_v3 = vsel %vm83_vm0, %v2978_v1, 0.0  ;;  %v128_v48 = vstv %s2047_s20  ;;  %v2053_v21 = vld [vmem:[%s3501_s7] ss:$0 sm:$0xff] }
  0x19   :  { %85 = vadd.xlane.f32.xlu0 %v84_v2  ;;  %2563 = vmatpush3.bf16.msra.mxu1 %v2560_v22  ;;  %v3061_v2 = vld [vmem:[%s3496_s2 + $0x28] sm:$0xff] }
  0x1a   :  { %2579 = vmatpush3.bf16.msra.mxu0 %v2576_v25  ;;  %2565 = vmatprep.subr.bf16.mxu1 %v2564_v28 }
  0x1d   :  { %88 = vadd.xlane.f32.xlu0 %v87_v3  ;;  %v3066_v3 = vld [vmem:[%s3496_s2 + $0x38] sm:$0xff] }
  0xa6   :  { %v86_v4 = vpop.xlane.xlu0 %85 }
  0xa7   :  { %v91_v5 = vmul.f32 0.03125, %v86_v4  ;;  %v3071_v4 = vld [vmem:[%s3496_s2] sm:$0xff] }
  0xa8   :  { %v3149_v54 = vpack.c.bf16 %v3051_v60, %v3071_v4 }
  0xa9   :  { %v2985_v6 = vsub.f32 %v2973_v0, %v91_v5 }
  0xaa   :  { %v89_v7 = vpop.xlane.xlu0 %88 }
  0xab   :  { %v92_v8 = vmul.f32 0.03125, %v89_v7  ;;  %v95_v9 = vmul.f32 %v2985_v6, %v2985_v6 }
  0xad   :  { %v2990_v10 = vsub.f32 %v2978_v1, %v92_v8  ;;  %v97_v11 = vsel %vm83_vm0, %v95_v9, 0.0  ;;  %v3076_v8 = vld [vmem:[%s3496_s2 + $0x10] sm:$0xff]  ;;  %v3081_v9 = vld [vmem:[%s3496_s2 + $0x20] sm:$0xff] }
  0xae   :  { %98 = vadd.xlane.f32.xlu1 %v97_v11 }
  0xaf   :  { %v96_v12 = vmul.f32 %v2990_v10, %v2990_v10 }
  0xb1   :  { %v100_v13 = vsel %vm83_vm0, %v96_v12, 0.0 }
  0xb2   :  { %101 = vadd.xlane.f32.xlu1 %v100_v13 }
 0x13b   :  { %v99_v29 = vpop.xlane.xlu1 %98 }
 0x13c   :  { %v103_v30 = vmul.f32 0.032258064, %v99_v29 }
 0x13e   :  { %2784 = vrsqrt.f32 %v103_v30  ;;  %vm107_vm1 = vcmp.eq.f32.partialorder %v103_v30, inf  ;;  %v110_v35 = vand.u32 2147483648, %v103_v30  ;;  %vm109_vm2 = vcmp.eq.f32.partialorder %v103_v30, 0.0 }
 0x13f   :  { %v102_v31 = vpop.xlane.xlu1 %101 }
 0x140   :  { %v104_v32 = vmul.f32 0.032258064, %v102_v31 }
 0x142   :  { %2786 = vrsqrt.f32 %v104_v32  ;;  %vm114_vm3 = vcmp.eq.f32.partialorder %v104_v32, inf  ;;  %v117_v41 = vand.u32 2147483648, %v104_v32  ;;  %vm116_vm4 = vcmp.eq.f32.partialorder %v104_v32, 0.0 }
 0x148   :  { %v2785_v33 = vpop.eup %2784 }
 0x149   :  { %v106_v34 = vmul.f32 %v2785_v33, %v103_v30 }
 0x14b   :  { %v108_v36 = vsel %vm107_vm1, %v103_v30, %v106_v34 }
 0x14c   :  { %v2787_v37 = vpop.eup %2786  ;;  %v111_v38 = vsel %vm109_vm2, %v110_v35, %v108_v36 }
 0x14d   :  { %v113_v39 = vmul.f32 %v2787_v37, %v104_v32  ;;  %v119_v40 = vadd.f32 1e-06, %v111_v38 }
 0x14f   :  { %v115_v42 = vsel %vm114_vm3, %v104_v32, %v113_v39  ;;  %2788 = vrcp.f32 %v119_v40 }
 0x150   :  { %v118_v43 = vsel %vm116_vm4, %v117_v41, %v115_v42 }
 0x151   :  { %v120_v44 = vadd.f32 1e-06, %v118_v43 }
 0x153   :  { %2790 = vrcp.f32 %v120_v44 }
 0x159   :  { %v2789_v46 = vpop.eup %2788 }
 0x15a   :  { %v124_v47 = vmul.f32 %v2789_v46, %v123_v45 }
 0x15c   :  { %v126_v49 = vmul.f32 %v124_v47, %v2985_v6 }
 0x15d   :  { %v2791_v50 = vpop.eup %2790 }
 0x15e   :  { %v125_v51 = vmul.f32 %v2791_v50, %v123_v45  ;;  %v129_v52 = vadd.f32 %v128_v48, %v126_v49  ;;  %v3136_v45 = vld [vmem:[%s3495_s1 + $0x8] sm:$0xff] }
 0x160   :  { %v127_v55 = vmul.f32 %v125_v51, %v2990_v10  ;;  %2302 = vmatprep.mubr.msk.f32.mxu1 %vm83_vm0, %v129_v52  ;;  %2324 = vmatprep.mubr.msk.f32.mxu0 %vm83_vm0, %v129_v52  ;;  %v3086_v10 = vld [vmem:[%s3496_s2 + $0x30] sm:$0xff]  ;;  %s2048_s2 = sld [smem:[#allocation2 + $0x2]] }
 0x162   :  { %v130_v56 = vadd.f32 %v128_v48, %v127_v55  ;;  %v3141_v48 = vld [vmem:[%s3495_s1] sm:$0xff] }
 0x164   :  { %2303 = vmatmul.mubr.msk.f32.vlgmr.msra.gmra.mrb[0].mxu1 %vm83_vm0, %v130_v56  ;;  %2325 = vmatmul.mubr.msk.f32.vlgmr.msra.gmra.mrb[0].mxu0 %vm83_vm0, %v130_v56 }
 0x165   :  { %2567 = vmatpush3.bf16.msra.mxu1 %v2564_v28  ;;  %2313 = vmatprep.mubr.msk.f32.mxu1 %vm83_vm0, %v129_v52 }
 0x166   :  { %2569 = vmatprep.subr.bf16.mxu1 %v2568_v57 }
 0x169   :  { %2571 = vmatpush3.bf16.msra.mxu1 %v2568_v57 }
 0x16c   :  { %2314 = vmatmul.mubr.msk.f32.vlgmr.msra.gmra.mrb[2].mxu1 %vm83_vm0, %v130_v56 }
 0x237   :  { %v2304_v62 = vpop.f32.mrb[0].mxu1  ;;  %v2326_v63 = vpop.f32.mrb[0].mxu0 }
 0x238   :  { %v392_v5 = vadd.f32 %v2326_v63, %v2056_v58  ;;  %v214_v6 = vpop.f32.mrb[1].mxu1  ;;  %v386_v7 = vpop.f32.mrb[1].mxu0  ;;  %v220_v43 = vadd.f32 %v2304_v62, %v3046_v59 }
 0x239   :  { %v215_v11 = vadd.f32 %v3046_v59, %v214_v6  ;;  %v387_v12 = vadd.f32 %v2056_v58, %v386_v7  ;;  %v3163_v7 = vpack.c.bf16 %v3061_v2, %v3081_v9 }
 0x23a   :  { %v404_v13 = vmul.f32 %v392_v5, %v3051_v60  ;;  %v406_v14 = vmul.f32 %v392_v5, %v3056_v61  ;;  %v408_v15 = vmul.f32 %v392_v5, %v3061_v2  ;;  %v410_v16 = vmul.f32 %v392_v5, %v3066_v3 }
 0x23b   :  { %2343 = vmatprep.mubr.msk.f32.mxu1 %vm83_vm0, %v215_v11  ;;  %v403_v17 = vmul.f32 %v387_v12, %v3071_v4  ;;  %v405_v18 = vmul.f32 %v387_v12, %v3076_v8  ;;  %v407_v19 = vmul.f32 %v387_v12, %v3081_v9  ;;  %v409_v20 = vmul.f32 %v387_v12, %v3086_v10  ;;  %v693_v12 = vld [vmem:[%s3504_s10] sm:$0xff] }
 0x23c   :  { %v3154_v5 = vpack.c.bf16 %v3056_v61, %v3076_v8  ;;  %v3169_v11 = vpack.c.bf16 %v3066_v3, %v3086_v10 }
 0x23d   :  { %v2604_v22 = vpack.c.bf16 %v404_v13, %v403_v17  ;;  %v2608_v23 = vpack.c.bf16 %v406_v14, %v405_v18  ;;  %v2612_v24 = vpack.c.bf16 %v408_v15, %v407_v19  ;;  %v2616_v25 = vpack.c.bf16 %v410_v16, %v409_v20  ;;  %v694_v13 = vld [vmem:[%s3504_s10 + $0x8] sm:$0xff]  ;;  %v695_v15 = vld [vmem:[%s3504_s10 + $0x10] sm:$0xff]  ;;  %v696_v16 = vld [vmem:[%s3504_s10 + $0x18] sm:$0xff] }
 0x23e   :  { %v2636_v14 = vpack.c.bf16 %v694_v13, %v693_v12  ;;  %v2640_v17 = vpack.c.bf16 %v696_v16, %v695_v15 }
 0x23f   :  { %v2315_v26 = vpop.f32.mrb[2].mxu1  ;;  %2605 = vmatprep.subr.bf16.mxu0 %v2604_v22 }
 0x240   :  { %v306_v27 = vadd.f32 %v2315_v26, %v2053_v21  ;;  %v300_v28 = vpop.f32.mrb[3].mxu1  ;;  %2607 = vmatpush3.bf16.msra.mxu0 %v2604_v22  ;;  %v2073_v26 = vld [vmem:[%s3505_s11] ss:$0 sm:$0xff] }
 0x241   :  { %v301_v29 = vadd.f32 %v2053_v21, %v300_v28  ;;  %2609 = vmatprep.subr.bf16.mxu0 %v2608_v23 }
 0x242   :  { %v396_v30 = vmul.f32 %v306_v27, %v3051_v60  ;;  %v398_v31 = vmul.f32 %v306_v27, %v3056_v61  ;;  %v400_v32 = vmul.f32 %v306_v27, %v3061_v2  ;;  %v402_v33 = vmul.f32 %v306_v27, %v3066_v3 }
 0x243   :  { %v395_v34 = vmul.f32 %v301_v29, %v3071_v4  ;;  %v397_v35 = vmul.f32 %v301_v29, %v3076_v8  ;;  %v399_v36 = vmul.f32 %v301_v29, %v3081_v9  ;;  %v401_v37 = vmul.f32 %v301_v29, %v3086_v10 }
 0x244   :  { %2611 = vmatpush3.bf16.msra.mxu0 %v2608_v23 }
 0x245   :  { %2613 = vmatprep.subr.bf16.mxu0 %v2612_v24  ;;  %v2580_v39 = vpack.c.bf16 %v396_v30, %v395_v34  ;;  %v2586_v40 = vpack.c.bf16 %v398_v31, %v397_v35  ;;  %v2592_v41 = vpack.c.bf16 %v400_v32, %v399_v36  ;;  %v2598_v42 = vpack.c.bf16 %v402_v33, %v401_v37 }
 0x247   :  { %2582 = vmatprep.subr.msk.bf16.mxu1 %vm3111_vm5, %v2580_v39 }
 0x248   :  { %2585 = vmatpush3.bf16.xpose.msk.msra.mxu1 %vm3111_vm5, %v2580_v39  ;;  %2615 = vmatpush3.bf16.msra.mxu0 %v2612_v24 }
 0x249   :  { %2588 = vmatprep.subr.msk.bf16.mxu1 %vm3111_vm5, %v2586_v40  ;;  %2617 = vmatprep.subr.bf16.mxu0 %v2616_v25 }
 0x24c   :  { %2619 = vmatpush3.bf16.msra.mxu0 %v2616_v25 }
 0x24d   :  { %2621 = vmatprep.subr.bf16.mxu0 %v3149_v54 }
 0x250   :  { %2591 = vmatpush3.bf16.xpose.msk.msra.mxu1 %vm3111_vm5, %v2586_v40 }
 0x251   :  { %2594 = vmatprep.subr.msk.bf16.mxu1 %vm3111_vm5, %v2592_v41 }
 0x258   :  { %2597 = vmatpush3.bf16.xpose.msk.msra.mxu1 %vm3111_vm5, %v2592_v41 }
 0x259   :  { %2600 = vmatprep.subr.msk.bf16.mxu1 %vm3111_vm5, %v2598_v42 }
 0x260   :  { %2603 = vmatpush3.bf16.xpose.msk.msra.mxu1 %vm3111_vm5, %v2598_v42 }
 0x261   :  { %2637 = vmatprep.subr.bf16.mxu1 %v2636_v14 }
 0x267   :  { %2344 = vmatmul.mubr.msk.f32.vlgmr.msra.gmra.mrb[4].mxu1 %vm83_vm0, %v220_v43 }
 0x268   :  { %2639 = vmatpush3.bf16.msra.mxu1 %v2636_v14 }
 0x269   :  { %2641 = vmatprep.subr.bf16.mxu1 %v2640_v17 }
 0x26c   :  { %2643 = vmatpush3.bf16.msra.mxu1 %v2640_v17 }
 0x33a   :  { %v2345_v44 = vpop.f32.mrb[4].mxu1 }
 0x33b   :  { %v517_v46 = vmul.f32 0.35355338, %v2345_v44  ;;  %v507_v47 = vpop.f32.mrb[5].mxu1  ;;  %v833_v44 = vld [vmem:[%s3506_s12] sm:$0xff] }
 0x33c   :  { %v516_v49 = vmul.f32 0.35355338, %v507_v47  ;;  %v835_v47 = vld [vmem:[%s3506_s12 + $0x10] sm:$0xff] }
 0x33d   :  { %v519_v50 = vadd.f32 %v517_v46, %v3136_v45  ;;  %v834_v46 = vld [vmem:[%s3506_s12 + $0x8] sm:$0xff] }
 0x33e   :  { %v518_v51 = vadd.f32 %v516_v49, %v3141_v48  ;;  %v2644_v49 = vpack.c.bf16 %v834_v46, %v833_v44 }
 0x33f   :  { %v524_v52 = vsel %vm520_vm6, %v519_v50, -inf }
 0x340   :  { %525 = vmax.xlane.f32.xlu1 %v524_v52  ;;  %v521_v53 = vsel %vm520_vm6, %v518_v51, -inf  ;;  %v927_v52 = vld [vmem:[%s3508_s14] sm:$0xff] }
 0x341   :  { %522 = vmax.xlane.f32.xlu0 %v521_v53  ;;  %v928_v53 = vld [vmem:[%s3508_s14 + $0x8] sm:$0xff] }
 0x3cd   :  { %v526_v55 = vpop.xlane.xlu1 %525 }
 0x3ce   :  { %v528_v56 = vsub.f32 %v519_v50, %v526_v55  ;;  %v523_v57 = vpop.xlane.xlu0 %522  ;;  %v836_v50 = vld [vmem:[%s3506_s12 + $0x18] sm:$0xff]  ;;  %v929_v55 = vld [vmem:[%s3508_s14 + $0x10] sm:$0xff] }
 0x3cf   :  { %v527_v58 = vsub.f32 %v518_v51, %v523_v57  ;;  %v2648_v51 = vpack.c.bf16 %v836_v50, %v835_v47  ;;  %v930_v57 = vld [vmem:[%s3508_s14 + $0x18] sm:$0xff]  ;;  %v2079_v50 = vld [vmem:[%s3509_s15] ss:$0 sm:$0xff] }
 0x3d0   :  { %v531_v59 = vmul.f32 1.442695, %v528_v56  ;;  %v2652_v56 = vpack.c.bf16 %v928_v53, %v927_v52 }
 0x3d1   :  { %v529_v62 = vmul.f32 1.442695, %v527_v58  ;;  %v2656_v58 = vpack.c.bf16 %v930_v57, %v929_v55 }
 0x3d2   :  { %2653 = vmatprep.subr.bf16.mxu1 %v2652_v56 }
 0x3d3   :  { %2792 = vpow2.f32 %v529_v62  ;;  %v932_v62 = vld [vmem:[%s3508_s14 + $0x28] sm:$0xff] }
 0x3d4   :  { %2794 = vpow2.f32 %v531_v59  ;;  %v931_v59 = vld [vmem:[%s3508_s14 + $0x20] sm:$0xff] }
 0x3dd   :  { %v2793_v63 = vpop.eup %2792 }
 0x3de   :  { %v2795_v6 = vpop.eup %2794  ;;  %2362 = vmatprep.mubr.msk.f32.mxu0 %vm520_vm6, %v2793_v63 }
 0x3df   :  { %2363 = vmatmul.mubr.msk.f32.vlgmr.msra.gmra.mrb[2].mxu0 %vm520_vm6, %v2795_v6 }
 0x3e0   :  { %2623 = vmatpush3.bf16.msra.mxu0 %v3149_v54  ;;  %2381 = vmatprep.mubr.msk.f32.mxu0 %vm520_vm6, %v2793_v63  ;;  %v2660_v63 = vpack.c.bf16 %v932_v62, %v931_v59 }
 0x3e1   :  { %2625 = vmatprep.subr.bf16.mxu0 %v3154_v5 }
 0x3e4   :  { %2627 = vmatpush3.bf16.msra.mxu0 %v3154_v5 }
 0x3e5   :  { %2629 = vmatprep.subr.bf16.mxu0 %v3163_v7 }
 0x3e8   :  { %2631 = vmatpush3.bf16.msra.mxu0 %v3163_v7 }
 0x3e9   :  { %2633 = vmatprep.subr.bf16.mxu0 %v3169_v11 }
 0x3ec   :  { %2635 = vmatpush3.bf16.msra.mxu0 %v3169_v11 }
 0x3ed   :  { %2645 = vmatprep.subr.bf16.mxu0 %v2644_v49 }
 0x3ef   :  { %2382 = vmatmul.mubr.msk.f32.vlgmr.msra.gmra.mrb[4].mxu0 %vm520_vm6, %v2795_v6 }
 0x3f0   :  { %2647 = vmatpush3.bf16.msra.mxu0 %v2644_v49 }
 0x3f1   :  { %2649 = vmatprep.subr.bf16.mxu0 %v2648_v51 }
 0x3f4   :  { %2651 = vmatpush3.bf16.msra.mxu0 %v2648_v51 }
 0x4b2   :  { %v2364_v18 = vpop.f32.mrb[2].mxu0 }
 0x4b3   :  { %v605_v19 = vpop.f32.mrb[3].mxu0 }
 0x4c2   :  { %v2383_v20 = vpop.f32.mrb[4].mxu0 }
 0x4c3   :  { %2796 = vrcp.f32 %v2383_v20  ;;  %v680_v21 = vpop.f32.mrb[5].mxu0 }
 0x4c4   :  { %2798 = vrcp.f32 %v680_v21 }
 0x4cd   :  { %v2797_v22 = vpop.eup %2796 }
 0x4ce   :  { %v2799_v23 = vpop.eup %2798  ;;  %v692_v24 = vmul.f32 %v2797_v22, %v2364_v18 }
 0x4cf   :  { %v691_v25 = vmul.f32 %v2799_v23, %v605_v19 }
 0x4d1   :  { %2392 = vmatprep.mubr.msk.f32.mxu1 %vm83_vm0, %v691_v25 }
 0x4d2   :  { %2393 = vmatmul.mubr.msk.f32.vlgmr.msra.gmra.mrb[6].mxu1 %vm83_vm0, %v692_v24 }
 0x4d3   :  { %2655 = vmatpush3.bf16.msra.mxu1 %v2652_v56 }
 0x4d4   :  { %2657 = vmatprep.subr.bf16.mxu1 %v2656_v58 }
 0x4d7   :  { %2659 = vmatpush3.bf16.msra.mxu1 %v2656_v58 }
 0x4d8   :  { %2661 = vmatprep.subr.bf16.mxu1 %v2660_v63 }
 0x4db   :  { %2663 = vmatpush3.bf16.msra.mxu1 %v2660_v63 }
 0x5a5   :  { %v2394_v27 = vpop.f32.mrb[6].mxu1 }
 0x5a6   :  { %v782_v28 = vadd.f32 %v2394_v27, %v2073_v26  ;;  %v776_v29 = vpop.f32.mrb[7].mxu1  ;;  %v825_v27 = vstv %s2048_s2 }
 0x5a7   :  { %v777_v30 = vadd.f32 %v2073_v26, %v776_v29 }
 0x5a8   :  { %v3193_v31 = vadd.f32 %v782_v28, %v2978_v1 }
 0x5a9   :  { %v3196_v32 = vadd.f32 %v777_v30, %v2973_v0 }
 0x5aa   :  { %v790_v33 = vsel %vm83_vm0, %v3193_v31, 0.0 }
 0x5ab   :  { %791 = vadd.xlane.f32.xlu1 %v790_v33  ;;  %v787_v34 = vsel %vm83_vm0, %v3196_v32, 0.0 }
 0x5ac   :  { %788 = vadd.xlane.f32.xlu0 %v787_v34 }
 0x638   :  { %v792_v35 = vpop.xlane.xlu1 %791 }
 0x639   :  { %v794_v36 = vmul.f32 0.03125, %v792_v35  ;;  %v789_v37 = vpop.xlane.xlu0 %788  ;;  %v830_v35 = vstv %s2049_s3 }
 0x63a   :  { %v793_v39 = vmul.f32 0.03125, %v789_v37 }
 0x63b   :  { %v3203_v40 = vsub.f32 %v3193_v31, %v794_v36 }
 0x63c   :  { %v3206_v1 = vsub.f32 %v3196_v32, %v793_v39 }
 0x63d   :  { %v798_v0 = vmul.f32 %v3203_v40, %v3203_v40 }
 0x63e   :  { %v797_v41 = vmul.f32 %v3206_v1, %v3206_v1 }
 0x63f   :  { %v802_v42 = vsel %vm83_vm0, %v798_v0, 0.0  ;;  %v933_v0 = vld [vmem:[%s3508_s14 + $0x30] sm:$0xff] }
 0x640   :  { %803 = vadd.xlane.f32.xlu1 %v802_v42  ;;  %v799_v43 = vsel %vm83_vm0, %v797_v41, 0.0  ;;  %v934_v41 = vld [vmem:[%s3508_s14 + $0x38] sm:$0xff] }
 0x641   :  { %800 = vadd.xlane.f32.xlu0 %v799_v43  ;;  %v2664_v42 = vpack.c.bf16 %v934_v41, %v933_v0 }
 0x643   :  { %2665 = vmatprep.subr.bf16.mxu1 %v2664_v42 }
 0x644   :  { %2667 = vmatpush3.bf16.msra.mxu1 %v2664_v42 }
 0x6cd   :  { %v804_v6 = vpop.xlane.xlu1 %803 }
 0x6ce   :  { %v806_v12 = vmul.f32 0.032258064, %v804_v6  ;;  %v801_v13 = vpop.xlane.xlu0 %800 }
 0x6cf   :  { %v805_v14 = vmul.f32 0.032258064, %v801_v13 }
 0x6d0   :  { %2800 = vrsqrt.f32 %v806_v12  ;;  %vm816_vm7 = vcmp.eq.f32.partialorder %v806_v12, inf  ;;  %v819_v18 = vand.u32 2147483648, %v806_v12  ;;  %vm818_vm8 = vcmp.eq.f32.partialorder %v806_v12, 0.0 }
 0x6d1   :  { %2802 = vrsqrt.f32 %v805_v14  ;;  %vm809_vm9 = vcmp.eq.f32.partialorder %v805_v14, inf  ;;  %v812_v21 = vand.u32 2147483648, %v805_v14  ;;  %vm811_vm10 = vcmp.eq.f32.partialorder %v805_v14, 0.0 }
 0x6da   :  { %v2801_v15 = vpop.eup %2800 }
 0x6db   :  { %v2803_v16 = vpop.eup %2802  ;;  %v815_v17 = vmul.f32 %v2801_v15, %v806_v12 }
 0x6dc   :  { %v808_v19 = vmul.f32 %v2803_v16, %v805_v14 }
 0x6dd   :  { %v817_v20 = vsel %vm816_vm7, %v806_v12, %v815_v17  ;;  %v2086_v17 = vld [vmem:[%s3498_s4 + $0x20] sm:$0xff] }
 0x6de   :  { %v820_v22 = vsel %vm818_vm8, %v819_v18, %v817_v20  ;;  %v810_v23 = vsel %vm809_vm9, %v805_v14, %v808_v19  ;;  %v2087_v18 = vld [vmem:[%s3498_s4 + $0x28] sm:$0xff]  ;;  %v2102_v19 = vld [vmem:[%s3502_s8 + $0x20] sm:$0xff] }
 0x6df   :  { %v822_v24 = vadd.f32 1e-06, %v820_v22  ;;  %v813_v25 = vsel %vm811_vm10, %v812_v21, %v810_v23  ;;  %v2668_v20 = vpack.c.bf16 %v2087_v18, %v2086_v17  ;;  %v2103_v21 = vld [vmem:[%s3502_s8 + $0x28] sm:$0xff]  ;;  %v2088_v22 = vld [vmem:[%s3498_s4 + $0x30] sm:$0xff]  ;;  %v2089_v23 = vld [vmem:[%s3498_s4 + $0x38] sm:$0xff] }
 0x6e0   :  { %v821_v26 = vadd.f32 1e-06, %v813_v25  ;;  %v2672_v25 = vpack.c.bf16 %v2089_v23, %v2088_v22 }
 0x6e1   :  { %2804 = vrcp.f32 %v822_v24  ;;  %v2684_v24 = vpack.c.bf16 %v2103_v21, %v2102_v19  ;;  %2669 = vmatprep.subr.bf16.mxu0 %v2668_v20 }
 0x6e2   :  { %2806 = vrcp.f32 %v821_v26  ;;  %v2104_v26 = vld [vmem:[%s3502_s8 + $0x30] sm:$0xff] }
 0x6e3   :  { %2685 = vmatprep.subr.bf16.mxu1 %v2684_v24 }
 0x6eb   :  { %v2805_v28 = vpop.eup %2804 }
 0x6ec   :  { %v2807_v29 = vpop.eup %2806  ;;  %v827_v30 = vmul.f32 %v2805_v28, %v825_v27 }
 0x6ed   :  { %v826_v33 = vmul.f32 %v2807_v29, %v825_v27  ;;  %v2105_v27 = vld [vmem:[%s3502_s8 + $0x38] sm:$0xff]  ;;  %v2094_v29 = vld [vmem:[%s3500_s6 + $0x20] sm:$0xff]  ;;  %s2082_s8 = sld [smem:[#allocation2 + $0x4]] }
 0x6ee   :  { %v829_v34 = vmul.f32 %v827_v30, %v3203_v40  ;;  %v2076_v40 = vld [vmem:[%s3507_s13] ss:$0 sm:$0xff]  ;;  %v2688_v28 = vpack.c.bf16 %v2105_v27, %v2104_v26  ;;  %v2095_v30 = vld [vmem:[%s3500_s6 + $0x28] sm:$0xff] }
 0x6ef   :  { %v828_v36 = vmul.f32 %v826_v33, %v3206_v1  ;;  %v2676_v33 = vpack.c.bf16 %v2095_v30, %v2094_v29 }
 0x6f0   :  { %v832_v39 = vadd.f32 %v830_v35, %v829_v34 }
 0x6f1   :  { %v831_v37 = vadd.f32 %v830_v35, %v828_v36 }
 0x6f3   :  { %2403 = vmatprep.mubr.msk.f32.mxu0 %vm83_vm0, %v831_v37 }
 0x6f4   :  { %2404 = vmatmul.mubr.msk.f32.vlgmr.msra.gmra.mrb[6].mxu0 %vm83_vm0, %v832_v39 }
 0x6f5   :  { %2671 = vmatpush3.bf16.msra.mxu0 %v2668_v20 }
 0x6f6   :  { %2673 = vmatprep.subr.bf16.mxu0 %v2672_v25 }
 0x6f9   :  { %2675 = vmatpush3.bf16.msra.mxu0 %v2672_v25 }
 0x6fa   :  { %2677 = vmatprep.subr.bf16.mxu0 %v2676_v33 }
 0x7c7   :  { %v2405_v1 = vpop.f32.mrb[6].mxu0 }
 0x7c8   :  { %v922_v43 = vadd.f32 %v2405_v1, %v2076_v40  ;;  %v916_v44 = vpop.f32.mrb[7].mxu0 }
 0x7c9   :  { %v917_v46 = vadd.f32 %v2076_v40, %v916_v44 }
 0x7ca   :  { %v926_v49 = vmax.f32 %v922_v43, 0.0 }
 0x7cb   :  { %v925_v47 = vmax.f32 %v917_v46, 0.0 }
 0x7cd   :  { %2422 = vmatprep.mubr.msk.f32.mxu1 %vm520_vm6, %v925_v47 }
 0x7ce   :  { %2423 = vmatmul.mubr.msk.f32.vlgmr.msra.gmra.mrb[8].mxu1 %vm520_vm6, %v926_v49 }
 0x7cf   :  { %2687 = vmatpush3.bf16.msra.mxu1 %v2684_v24 }
 0x7d0   :  { %2689 = vmatprep.subr.bf16.mxu1 %v2688_v28 }
 0x7d3   :  { %2691 = vmatpush3.bf16.msra.mxu1 %v2688_v28 }
 0x8a1   :  { %v2424_v51 = vpop.f32.mrb[8].mxu1 }
 0x8a2   :  { %v1020_v52 = vadd.f32 %v2424_v51, %v2079_v50  ;;  %v1014_v53 = vpop.f32.mrb[9].mxu1  ;;  %v1067_v51 = vstv %s2082_s8 }
 0x8a3   :  { %v1015_v55 = vadd.f32 %v2079_v50, %v1014_v53 }
 0x8a4   :  { %v3263_v56 = vadd.f32 %v1020_v52, %v3193_v31 }
 0x8a5   :  { %v3266_v57 = vadd.f32 %v1015_v55, %v3196_v32 }
 0x8a6   :  { %v1032_v58 = vsel %vm83_vm0, %v3263_v56, 0.0 }
 0x8a7   :  { %1033 = vadd.xlane.f32.xlu1 %v1032_v58  ;;  %v1029_v59 = vsel %vm83_vm0, %v3266_v57, 0.0 }
 0x8a8   :  { %1030 = vadd.xlane.f32.xlu0 %v1029_v59 }
 0x934   :  { %v1034_v62 = vpop.xlane.xlu1 %1033 }
 0x935   :  { %v1036_v63 = vmul.f32 0.03125, %v1034_v62  ;;  %v1031_v6 = vpop.xlane.xlu0 %1030  ;;  %v1072_v62 = vstv %s2083_s22 }
 0x936   :  { %v1035_v12 = vmul.f32 0.03125, %v1031_v6  ;;  %v2096_v6 = vld [vmem:[%s3500_s6 + $0x30] sm:$0xff] }
 0x937   :  { %v3273_v13 = vsub.f32 %v3263_v56, %v1036_v63 }
 0x938   :  { %v3276_v31 = vsub.f32 %v3266_v57, %v1035_v12  ;;  %v2097_v12 = vld [vmem:[%s3500_s6 + $0x38] sm:$0xff] }
 0x939   :  { %v1040_v32 = vmul.f32 %v3273_v13, %v3273_v13 }
 0x93a   :  { %v1039_v14 = vmul.f32 %v3276_v31, %v3276_v31 }
 0x93b   :  { %v1044_v15 = vsel %vm83_vm0, %v1040_v32, 0.0 }
 0x93c   :  { %1045 = vadd.xlane.f32.xlu1 %v1044_v15  ;;  %v1041_v16 = vsel %vm83_vm0, %v1039_v14, 0.0  ;;  %v2680_v15 = vpack.c.bf16 %v2097_v12, %v2096_v6 }
 0x93d   :  { %1042 = vadd.xlane.f32.xlu0 %v1041_v16 }
 0x9c9   :  { %v1046_v34 = vpop.xlane.xlu1 %1045 }
 0x9ca   :  { %v1048_v35 = vmul.f32 0.032258064, %v1046_v34  ;;  %v1043_v36 = vpop.xlane.xlu0 %1042 }
 0x9cb   :  { %v1047_v37 = vmul.f32 0.032258064, %v1043_v36 }
 0x9cc   :  { %2808 = vrsqrt.f32 %v1048_v35  ;;  %vm1058_vm11 = vcmp.eq.f32.partialorder %v1048_v35, inf  ;;  %v1061_v42 = vand.u32 2147483648, %v1048_v35  ;;  %vm1060_vm12 = vcmp.eq.f32.partialorder %v1048_v35, 0.0 }
 0x9cd   :  { %2810 = vrsqrt.f32 %v1047_v37  ;;  %vm1051_vm13 = vcmp.eq.f32.partialorder %v1047_v37, inf  ;;  %v1054_v43 = vand.u32 2147483648, %v1047_v37  ;;  %vm1053_vm14 = vcmp.eq.f32.partialorder %v1047_v37, 0.0 }
 0x9d6   :  { %v2809_v39 = vpop.eup %2808 }
 0x9d7   :  { %v2811_v0 = vpop.eup %2810  ;;  %v1057_v41 = vmul.f32 %v2809_v39, %v1048_v35 }
 0x9d8   :  { %v1050_v40 = vmul.f32 %v2811_v0, %v1047_v37 }
 0x9d9   :  { %v1059_v1 = vsel %vm1058_vm11, %v1048_v35, %v1057_v41 }
 0x9da   :  { %v1062_v44 = vsel %vm1060_vm12, %v1061_v42, %v1059_v1  ;;  %v1052_v46 = vsel %vm1051_vm13, %v1047_v37, %v1050_v40 }
 0x9db   :  { %v1064_v47 = vadd.f32 1e-06, %v1062_v44  ;;  %v1055_v49 = vsel %vm1053_vm14, %v1054_v43, %v1052_v46 }
 0x9dc   :  { %v1063_v50 = vadd.f32 1e-06, %v1055_v49 }
 0x9dd   :  { %2812 = vrcp.f32 %v1064_v47 }
 0x9de   :  { %2814 = vrcp.f32 %v1063_v50 }
 0x9e7   :  { %v2813_v52 = vpop.eup %2812 }
 0x9e8   :  { %v2815_v53 = vpop.eup %2814  ;;  %v1069_v55 = vmul.f32 %v2813_v52, %v1067_v51 }
 0x9e9   :  { %v1068_v58 = vmul.f32 %v2815_v53, %v1067_v51 }
 0x9ea   :  { %v1071_v59 = vmul.f32 %v1069_v55, %v3273_v13  ;;  %v2107_v13 = vld [vmem:[%s3503_s9 + $0x1] ss:$0 sm:$0xff] }
 0x9eb   :  { %v1070_v63 = vmul.f32 %v1068_v58, %v3276_v31  ;;  %v2091_v31 = vld [vmem:[%s3499_s5 + $0x1] ss:$0 sm:$0xff] }
 0x9ec   :  { %v1074_v14 = vadd.f32 %v1072_v62, %v1071_v59 }
 0x9ed   :  { %v1073_v32 = vadd.f32 %v1072_v62, %v1070_v63 }
 0x9ef   :  { %2433 = vmatprep.mubr.msk.f32.mxu0 %vm83_vm0, %v1073_v32  ;;  %2455 = vmatprep.mubr.msk.f32.mxu1 %vm83_vm0, %v1073_v32 }
 0x9f0   :  { %2434 = vmatmul.mubr.msk.f32.vlgmr.msra.gmra.mrb[8].mxu0 %vm83_vm0, %v1074_v14  ;;  %2456 = vmatmul.mubr.msk.f32.vlgmr.msra.gmra.mrb[10].mxu1 %vm83_vm0, %v1074_v14 }
 0x9f1   :  { %2679 = vmatpush3.bf16.msra.mxu0 %v2676_v33  ;;  %2444 = vmatprep.mubr.msk.f32.mxu0 %vm83_vm0, %v1073_v32  ;;  %v2099_v33 = vld [vmem:[%s3501_s7 + $0x1] ss:$0 sm:$0xff] }
 0x9f2   :  { %2681 = vmatprep.subr.bf16.mxu0 %v2680_v15 }
 0x9f5   :  { %2683 = vmatpush3.bf16.msra.mxu0 %v2680_v15 }
 0x9f8   :  { %2445 = vmatmul.mubr.msk.f32.vlgmr.msra.gmra.mrb[10].mxu0 %vm83_vm0, %v1074_v14 }
 0xac3   :  { %v2435_v16 = vpop.f32.mrb[8].mxu0  ;;  %v2457_v17 = vpop.f32.mrb[10].mxu1 }
 0xac4   :  { %v1342_v18 = vadd.f32 %v2457_v17, %v2107_v13  ;;  %v1160_v19 = vpop.f32.mrb[9].mxu0  ;;  %v1336_v20 = vpop.f32.mrb[11].mxu1 }
 0xac5   :  { %v1161_v21 = vadd.f32 %v2091_v31, %v1160_v19  ;;  %v1337_v22 = vadd.f32 %v2107_v13, %v1336_v20 }
 0xac6   :  { %v1354_v23 = vmul.f32 %v1342_v18, %v3051_v60  ;;  %v1356_v24 = vmul.f32 %v1342_v18, %v3056_v61  ;;  %v1358_v25 = vmul.f32 %v1342_v18, %v3061_v2  ;;  %v1360_v26 = vmul.f32 %v1342_v18, %v3066_v3 }
 0xac7   :  { %2474 = vmatprep.mubr.msk.f32.mxu0 %vm83_vm0, %v1161_v21  ;;  %v1353_v27 = vmul.f32 %v1337_v22, %v3071_v4  ;;  %v1355_v28 = vmul.f32 %v1337_v22, %v3076_v8  ;;  %v1357_v29 = vmul.f32 %v1337_v22, %v3081_v9  ;;  %v1359_v30 = vmul.f32 %v1337_v22, %v3086_v10  ;;  %v2129_v21 = vld [vmem:[%s3505_s11 + $0x1] ss:$0 sm:$0xff] }
 0xac9   :  { %v2716_v34 = vpack.c.bf16 %v1354_v23, %v1353_v27  ;;  %v2720_v35 = vpack.c.bf16 %v1356_v24, %v1355_v28  ;;  %v2724_v36 = vpack.c.bf16 %v1358_v25, %v1357_v29  ;;  %v2728_v37 = vpack.c.bf16 %v1360_v26, %v1359_v30 }
 0xacb   :  { %v2446_v39 = vpop.f32.mrb[10].mxu0  ;;  %2717 = vmatprep.subr.bf16.mxu1 %v2716_v34 }
 0xacc   :  { %v1254_v0 = vadd.f32 %v2446_v39, %v2099_v33  ;;  %v1248_v41 = vpop.f32.mrb[11].mxu0  ;;  %2719 = vmatpush3.bf16.msra.mxu1 %v2716_v34 }
 0xacd   :  { %v1249_v42 = vadd.f32 %v2099_v33, %v1248_v41  ;;  %2721 = vmatprep.subr.bf16.mxu1 %v2720_v35  ;;  %v2132_v41 = vld [vmem:[%s3506_s12 + $0x20] sm:$0xff] }
 0xace   :  { %v1346_v40 = vmul.f32 %v1254_v0, %v3051_v60  ;;  %v1348_v1 = vmul.f32 %v1254_v0, %v3056_v61  ;;  %v1350_v43 = vmul.f32 %v1254_v0, %v3061_v2  ;;  %v1352_v44 = vmul.f32 %v1254_v0, %v3066_v3 }
 0xacf   :  { %v1345_v46 = vmul.f32 %v1249_v42, %v3071_v4  ;;  %v1347_v47 = vmul.f32 %v1249_v42, %v3076_v8  ;;  %v1349_v49 = vmul.f32 %v1249_v42, %v3081_v9  ;;  %v1351_v50 = vmul.f32 %v1249_v42, %v3086_v10  ;;  %v2133_v42 = vld [vmem:[%s3506_s12 + $0x28] sm:$0xff] }
 0xad0   :  { %2723 = vmatpush3.bf16.msra.mxu1 %v2720_v35  ;;  %v1166_v61 = vadd.f32 %v2435_v16, %v2091_v31 }
 0xad1   :  { %2725 = vmatprep.subr.bf16.mxu1 %v2724_v36  ;;  %v2692_v51 = vpack.c.bf16 %v1346_v40, %v1345_v46  ;;  %v2698_v52 = vpack.c.bf16 %v1348_v1, %v1347_v47  ;;  %v2704_v53 = vpack.c.bf16 %v1350_v43, %v1349_v49  ;;  %v2710_v60 = vpack.c.bf16 %v1352_v44, %v1351_v50  ;;  %v2134_v40 = vld [vmem:[%s3506_s12 + $0x30] sm:$0xff]  ;;  %v2135_v43 = vld [vmem:[%s3506_s12 + $0x38] sm:$0xff]  ;;  %v2140_v46 = vld [vmem:[%s3508_s14 + $0x40] sm:$0xff] }
 0xad2   :  { %v2756_v1 = vpack.c.bf16 %v2133_v42, %v2132_v41  ;;  %v2760_v44 = vpack.c.bf16 %v2135_v43, %v2134_v40  ;;  %v2141_v47 = vld [vmem:[%s3508_s14 + $0x48] sm:$0xff]  ;;  %v2142_v49 = vld [vmem:[%s3508_s14 + $0x50] sm:$0xff] }
 0xad3   :  { %2694 = vmatprep.subr.msk.bf16.mxu0 %vm3111_vm5, %v2692_v51  ;;  %v2764_v50 = vpack.c.bf16 %v2141_v47, %v2140_v46 }
 0xad4   :  { %2697 = vmatpush3.bf16.xpose.msk.msra.mxu0 %vm3111_vm5, %v2692_v51  ;;  %2727 = vmatpush3.bf16.msra.mxu1 %v2724_v36  ;;  %v2143_v51 = vld [vmem:[%s3508_s14 + $0x58] sm:$0xff] }
 0xad5   :  { %2700 = vmatprep.subr.msk.bf16.mxu0 %vm3111_vm5, %v2698_v52  ;;  %2729 = vmatprep.subr.bf16.mxu1 %v2728_v37 }
 0xad8   :  { %2731 = vmatpush3.bf16.msra.mxu1 %v2728_v37 }
 0xad9   :  { %2733 = vmatprep.subr.bf16.mxu1 %v3149_v54 }
 0xadc   :  { %2703 = vmatpush3.bf16.xpose.msk.msra.mxu0 %vm3111_vm5, %v2698_v52  ;;  %v2768_v52 = vpack.c.bf16 %v2143_v51, %v2142_v49 }
 0xadd   :  { %2706 = vmatprep.subr.msk.bf16.mxu0 %vm3111_vm5, %v2704_v53 }
 0xae4   :  { %2709 = vmatpush3.bf16.xpose.msk.msra.mxu0 %vm3111_vm5, %v2704_v53  ;;  %v2144_v53 = vld [vmem:[%s3508_s14 + $0x60] sm:$0xff] }
 0xae5   :  { %2712 = vmatprep.subr.msk.bf16.mxu0 %vm3111_vm5, %v2710_v60 }
 0xaec   :  { %2715 = vmatpush3.bf16.xpose.msk.msra.mxu0 %vm3111_vm5, %v2710_v60  ;;  %v2145_v60 = vld [vmem:[%s3508_s14 + $0x68] sm:$0xff] }
 0xaf3   :  { %2475 = vmatmul.mubr.msk.f32.vlgmr.msra.gmra.mrb[12].mxu0 %vm83_vm0, %v1166_v61  ;;  %v2772_v61 = vpack.c.bf16 %v2145_v60, %v2144_v53 }
 0xbc6   :  { %v2476_v2 = vpop.f32.mrb[12].mxu0 }
 0xbc7   :  { %v1467_v3 = vmul.f32 0.35355338, %v2476_v2  ;;  %v1457_v4 = vpop.f32.mrb[13].mxu0 }
 0xbc8   :  { %v1466_v8 = vmul.f32 0.35355338, %v1457_v4 }
 0xbc9   :  { %v1469_v9 = vadd.f32 %v1467_v3, %v3136_v45  ;;  %v2124_v45 = vld [vmem:[%s3504_s10 + $0x20] sm:$0xff] }
 0xbca   :  { %v1468_v10 = vadd.f32 %v1466_v8, %v3141_v48  ;;  %v2125_v48 = vld [vmem:[%s3504_s10 + $0x28] sm:$0xff] }
 0xbcb   :  { %v1473_v55 = vsel %vm520_vm6, %v1469_v9, -inf }
 0xbcc   :  { %1474 = vmax.xlane.f32.xlu1 %v1473_v55  ;;  %v1470_v58 = vsel %vm520_vm6, %v1468_v10, -inf }
 0xbcd   :  { %1471 = vmax.xlane.f32.xlu0 %v1470_v58 }
 0xc59   :  { %v1475_v59 = vpop.xlane.xlu1 %1474 }
 0xc5a   :  { %v1477_v38 = vsub.f32 %v1469_v9, %v1475_v59  ;;  %v1472_v62 = vpop.xlane.xlu0 %1471 }
 0xc5b   :  { %v1476_v63 = vsub.f32 %v1468_v10, %v1472_v62 }
 0xc5c   :  { %v1480_v6 = vmul.f32 1.442695, %v1477_v38 }
 0xc5d   :  { %v1478_v12 = vmul.f32 1.442695, %v1476_v63 }
 0xc5f   :  { %2816 = vpow2.f32 %v1478_v12 }
 0xc60   :  { %2818 = vpow2.f32 %v1480_v6 }
 0xc69   :  { %v2817_v32 = vpop.eup %2816 }
 0xc6a   :  { %v2819_v14 = vpop.eup %2818  ;;  %2493 = vmatprep.mubr.msk.f32.mxu1 %vm520_vm6, %v2817_v32 }
 0xc6b   :  { %2494 = vmatmul.mubr.msk.f32.vlgmr.msra.gmra.mrb[12].mxu1 %vm520_vm6, %v2819_v14 }
 0xc6c   :  { %2735 = vmatpush3.bf16.msra.mxu1 %v3149_v54  ;;  %2512 = vmatprep.mubr.msk.f32.mxu1 %vm520_vm6, %v2817_v32  ;;  %v2748_v54 = vpack.c.bf16 %v2125_v48, %v2124_v45  ;;  %v1776_v45 = vstv %s2084_s30 }
 0xc6d   :  { %2737 = vmatprep.subr.bf16.mxu1 %v3154_v5 }
 0xc6e   :  { %2749 = vmatprep.subr.bf16.mxu0 %v2748_v54 }
 0xc6f   :  { %2751 = vmatpush3.bf16.msra.mxu0 %v2748_v54 }
 0xc70   :  { %2739 = vmatpush3.bf16.msra.mxu1 %v3154_v5  ;;  %v2126_v5 = vld [vmem:[%s3504_s10 + $0x30] sm:$0xff] }
 0xc71   :  { %2741 = vmatprep.subr.bf16.mxu1 %v3163_v7 }
 0xc74   :  { %2743 = vmatpush3.bf16.msra.mxu1 %v3163_v7  ;;  %v2127_v7 = vld [vmem:[%s3504_s10 + $0x38] sm:$0xff] }
 0xc75   :  { %2745 = vmatprep.subr.bf16.mxu1 %v3169_v11 }
 0xc78   :  { %2747 = vmatpush3.bf16.msra.mxu1 %v3169_v11  ;;  %v2752_v11 = vpack.c.bf16 %v2127_v7, %v2126_v5 }
 0xc79   :  { %2757 = vmatprep.subr.bf16.mxu1 %v2756_v1 }
 0xc7a   :  { %2753 = vmatprep.subr.bf16.mxu0 %v2752_v11 }
 0xc7b   :  { %2513 = vmatmul.mubr.msk.f32.vlgmr.msra.gmra.mrb[14].mxu1 %vm520_vm6, %v2819_v14  ;;  %2755 = vmatpush3.bf16.msra.mxu0 %v2752_v11 }
 0xc7c   :  { %2759 = vmatpush3.bf16.msra.mxu1 %v2756_v1  ;;  %2765 = vmatprep.subr.bf16.mxu0 %v2764_v50 }
 0xc7d   :  { %2761 = vmatprep.subr.bf16.mxu1 %v2760_v44 }
 0xc80   :  { %2763 = vmatpush3.bf16.msra.mxu1 %v2760_v44 }
 0xd3e   :  { %v2495_v15 = vpop.f32.mrb[12].mxu1 }
 0xd3f   :  { %v1554_v13 = vpop.f32.mrb[13].mxu1 }
 0xd4e   :  { %v2514_v31 = vpop.f32.mrb[14].mxu1 }
 0xd4f   :  { %2820 = vrcp.f32 %v2514_v31  ;;  %v1629_v16 = vpop.f32.mrb[15].mxu1 }
 0xd50   :  { %2822 = vrcp.f32 %v1629_v16 }
 0xd59   :  { %v2821_v17 = vpop.eup %2820 }
 0xd5a   :  { %v2823_v18 = vpop.eup %2822  ;;  %v1641_v19 = vmul.f32 %v2821_v17, %v2495_v15  ;;  %v1781_v15 = vstv %s2085_s0  ;;  %v2146_v17 = vld [vmem:[%s3508_s14 + $0x70] sm:$0xff] }
 0xd5b   :  { %v1640_v20 = vmul.f32 %v2823_v18, %v1554_v13  ;;  %v2147_v18 = vld [vmem:[%s3508_s14 + $0x78] sm:$0xff]  ;;  %s2153_s14 = sld [smem:[#allocation2 + $0x9]] }
 0xd5d   :  { %2523 = vmatprep.mubr.msk.f32.mxu0 %vm83_vm0, %v1640_v20  ;;  %v2137_v20 = vld [vmem:[%s3507_s13 + $0x1] ss:$0 sm:$0xff]  ;;  %s2152_s13 = sld [smem:[#allocation2 + $0x8]] }
 0xd5e   :  { %2524 = vmatmul.mubr.msk.f32.vlgmr.msra.gmra.mrb[14].mxu0 %vm83_vm0, %v1641_v19  ;;  %v2776_v19 = vpack.c.bf16 %v2147_v18, %v2146_v17 }
 0xd5f   :  { %2767 = vmatpush3.bf16.msra.mxu0 %v2764_v50 }
 0xd60   :  { %2769 = vmatprep.subr.bf16.mxu0 %v2768_v52 }
 0xd63   :  { %2771 = vmatpush3.bf16.msra.mxu0 %v2768_v52 }
 0xd64   :  { %2773 = vmatprep.subr.bf16.mxu0 %v2772_v61 }
 0xd67   :  { %2775 = vmatpush3.bf16.msra.mxu0 %v2772_v61 }
 0xd68   :  { %2777 = vmatprep.subr.bf16.mxu0 %v2776_v19 }
 0xd6b   :  { %2779 = vmatpush3.bf16.msra.mxu0 %v2776_v19 }
 0xe31   :  { %v2525_v22 = vpop.f32.mrb[14].mxu0 }
 0xe32   :  { %v1733_v23 = vadd.f32 %v2525_v22, %v2129_v21  ;;  %v1727_v24 = vpop.f32.mrb[15].mxu0 }
 0xe33   :  { %v1728_v25 = vadd.f32 %v2129_v21, %v1727_v24 }
 0xe34   :  { %v3405_v26 = vadd.f32 %v1733_v23, %v3263_v56 }
 0xe35   :  { %v3408_v27 = vadd.f32 %v1728_v25, %v3266_v57 }
 0xe36   :  { %v1741_v28 = vsel %vm83_vm0, %v3405_v26, 0.0 }
 0xe37   :  { %1742 = vadd.xlane.f32.xlu1 %v1741_v28  ;;  %v1738_v29 = vsel %vm83_vm0, %v3408_v27, 0.0 }
 0xe38   :  { %1739 = vadd.xlane.f32.xlu0 %v1738_v29  ;;  %v2149_v29 = vld [vmem:[%s3509_s15 + $0x1] ss:$0 sm:$0xff]  ;;  %s2879_s15 = smov [#allocation5]  }
 0xe39   :  { %s2035_s21 = sshll.u32 %s2879_s15, 4  ;;  %s2036_s21 = int_to_ptr.vmem [resolvable:$true] %s2035_s21 }
 0xe3a   :  { %s2852_s8 = scalar_lea.vmem %s2036_s21, 256  ;;  %p2857_p6 = scmp.lt.s32.totalorder %s2036_s21, %s2036_s21 }
 0xe3b   :  { %p2853_p5 = scmp.ne.s32.totalorder %s2036_s21, %s2852_s8  ;;  %p2858_p7 = scmp.lt.s32.totalorder %s2852_s8, %s2852_s8 }
 0xe3d   :  { %p2859_p8 = por %p2858_p7, %p2857_p6 }
 0xe3f   :  { %p2860_p9 = pnand %p2859_p8, %p2853_p5 }
 0xec4   :  { %v1743_v30 = vpop.xlane.xlu1 %1742 }
 0xec5   :  { %v1745_v33 = vmul.f32 0.03125, %v1743_v30  ;;  %v1740_v34 = vpop.xlane.xlu0 %1739 }
 0xec6   :  { %v1744_v35 = vmul.f32 0.03125, %v1740_v34 }
 0xec7   :  { %v3415_v36 = vsub.f32 %v3405_v26, %v1745_v33 }
 0xec8   :  { %v3418_v56 = vsub.f32 %v3408_v27, %v1744_v35 }
 0xec9   :  { %v1749_v57 = vmul.f32 %v3415_v36, %v3415_v36 }
 0xeca   :  { %v1748_v37 = vmul.f32 %v3418_v56, %v3418_v56 }
 0xecb   :  { %v1753_v39 = vsel %vm83_vm0, %v1749_v57, 0.0 }
 0xecc   :  { %1754 = vadd.xlane.f32.xlu1 %v1753_v39  ;;  %v1750_v0 = vsel %vm83_vm0, %v1748_v37, 0.0 }
 0xecd   :  { %1751 = vadd.xlane.f32.xlu0 %v1750_v0 }
 0xf59   :  { %v1755_v2 = vpop.xlane.xlu1 %1754 }
 0xf5a   :  { %v1757_v3 = vmul.f32 0.032258064, %v1755_v2  ;;  %v1752_v4 = vpop.xlane.xlu0 %1751 }
 0xf5b   :  { %v1756_v8 = vmul.f32 0.032258064, %v1752_v4 }
 0xf5c   :  { %2824 = vrsqrt.f32 %v1757_v3  ;;  %vm1767_vm15 = vcmp.eq.f32.partialorder %v1757_v3, inf  ;;  %v1770_v58 = vand.u32 2147483648, %v1757_v3  ;;  %vm1769_vm1 = vcmp.eq.f32.partialorder %v1757_v3, 0.0 }
 0xf5d   :  { %2826 = vrsqrt.f32 %v1756_v8  ;;  %vm1760_vm2 = vcmp.eq.f32.partialorder %v1756_v8, inf  ;;  %v1763_v62 = vand.u32 2147483648, %v1756_v8  ;;  %vm1762_vm3 = vcmp.eq.f32.partialorder %v1756_v8, 0.0 }
 0xf66   :  { %v2825_v9 = vpop.eup %2824 }
 0xf67   :  { %v2827_v10 = vpop.eup %2826  ;;  %v1766_v55 = vmul.f32 %v2825_v9, %v1757_v3 }
 0xf68   :  { %v1759_v59 = vmul.f32 %v2827_v10, %v1756_v8 }
 0xf69   :  { %v1768_v38 = vsel %vm1767_vm15, %v1757_v3, %v1766_v55 }
 0xf6a   :  { %v1771_v63 = vsel %vm1769_vm1, %v1770_v58, %v1768_v38  ;;  %v1761_v6 = vsel %vm1760_vm2, %v1756_v8, %v1759_v59  ;;  %v2020_v58 = vstv %s2152_s13 }
 0xf6b   :  { %v1773_v12 = vadd.f32 1e-06, %v1771_v63  ;;  %v1764_v32 = vsel %vm1762_vm3, %v1763_v62, %v1761_v6  ;;  %v2025_v6 = vstv %s2153_s14 }
 0xf6c   :  { %v1772_v14 = vadd.f32 1e-06, %v1764_v32 }
 0xf6d   :  { %2828 = vrcp.f32 %v1773_v12 }
 0xf6e   :  { %2830 = vrcp.f32 %v1772_v14 }
 0xf77   :  { %v2829_v48 = vpop.eup %2828 }
 0xf78   :  { %v2831_v54 = vpop.eup %2830  ;;  %v1778_v5 = vmul.f32 %v2829_v48, %v1776_v45 }
 0xf79   :  { %v1777_v7 = vmul.f32 %v2831_v54, %v1776_v45 }
 0xf7a   :  { %v1780_v11 = vmul.f32 %v1778_v5, %v3415_v36 }
 0xf7b   :  { %v1779_v13 = vmul.f32 %v1777_v7, %v3418_v56 }
 0xf7c   :  { %v1783_v16 = vadd.f32 %v1781_v15, %v1780_v11 }
 0xf7d   :  { %v1782_v31 = vadd.f32 %v1781_v15, %v1779_v13 }
 0xf7f   :  { %2534 = vmatprep.mubr.msk.f32.mxu1 %vm83_vm0, %v1782_v31 }
 0xf80   :  { %2535 = vmatmul.mubr.msk.f32.vlgmr.msra.gmra.mrb[16].mxu1 %vm83_vm0, %v1783_v16 }
0x1053   :  { %v2536_v21 = vpop.f32.mrb[16].mxu1 }
0x1054   :  { %v1875_v22 = vadd.f32 %v2536_v21, %v2137_v20  ;;  %v1869_v23 = vpop.f32.mrb[17].mxu1 }
0x1055   :  { %v1870_v24 = vadd.f32 %v2137_v20, %v1869_v23 }
0x1056   :  { %v1879_v28 = vmax.f32 %v1875_v22, 0.0 }
0x1057   :  { %v1878_v25 = vmax.f32 %v1870_v24, 0.0 }
0x1059   :  { %2553 = vmatprep.mubr.msk.f32.mxu0 %vm520_vm6, %v1878_v25 }
0x105a   :  { %2554 = vmatmul.mubr.msk.f32.vlgmr.msra.gmra.mrb[16].mxu0 %vm520_vm6, %v1879_v28 }
0x112d   :  { %v2555_v30 = vpop.f32.mrb[16].mxu0 }
0x112e   :  { %v1975_v33 = vadd.f32 %v2555_v30, %v2149_v29  ;;  %v1969_v34 = vpop.f32.mrb[17].mxu0 }
0x112f   :  { %v1970_v35 = vadd.f32 %v2149_v29, %v1969_v34 }
0x1130   :  { %v1979_v36 = vadd.f32 %v1975_v33, %v3405_v26 }
0x1131   :  { %v1978_v56 = vadd.f32 %v1970_v35, %v3408_v27 }
0x1132   :  { %v1985_v57 = vsel %vm83_vm0, %v1979_v36, 0.0 }
0x1133   :  { %1986 = vadd.xlane.f32.xlu1 %v1985_v57  ;;  %v1982_v37 = vsel %vm83_vm0, %v1978_v56, 0.0 }
0x1134   :  { %1983 = vadd.xlane.f32.xlu0 %v1982_v37 }
0x11c0   :  { %v1987_v39 = vpop.xlane.xlu1 %1986 }
0x11c1   :  { %v1989_v0 = vmul.f32 0.03125, %v1987_v39  ;;  %v1984_v41 = vpop.xlane.xlu0 %1983 }
0x11c2   :  { %v1988_v42 = vmul.f32 0.03125, %v1984_v41 }
0x11c3   :  { %v1991_v40 = vsub.f32 %v1979_v36, %v1989_v0 }
0x11c4   :  { %v1990_v1 = vsub.f32 %v1978_v56, %v1988_v42 }
0x11c5   :  { %v1993_v43 = vmul.f32 %v1991_v40, %v1991_v40 }
0x11c6   :  { %v1992_v44 = vmul.f32 %v1990_v1, %v1990_v1 }
0x11c7   :  { %v1997_v46 = vsel %vm83_vm0, %v1993_v43, 0.0 }
0x11c8   :  { %1998 = vadd.xlane.f32.xlu1 %v1997_v46  ;;  %v1994_v26 = vsel %vm83_vm0, %v1992_v44, 0.0 }
0x11c9   :  { %1995 = vadd.xlane.f32.xlu0 %v1994_v26 }
0x1255   :  { %v1999_v27 = vpop.xlane.xlu1 %1998 }
0x1256   :  { %v2001_v47 = vmul.f32 0.032258064, %v1999_v27  ;;  %v1996_v49 = vpop.xlane.xlu0 %1995 }
0x1257   :  { %v2000_v50 = vmul.f32 0.032258064, %v1996_v49 }
0x1258   :  { %2832 = vrsqrt.f32 %v2001_v47  ;;  %vm2011_vm4 = vcmp.eq.f32.partialorder %v2001_v47, inf  ;;  %v2014_v60 = vand.u32 2147483648, %v2001_v47  ;;  %vm2013_vm5 = vcmp.eq.f32.partialorder %v2001_v47, 0.0 }
0x1259   :  { %2834 = vrsqrt.f32 %v2000_v50  ;;  %vm2004_vm6 = vcmp.eq.f32.partialorder %v2000_v50, inf  ;;  %v2007_v3 = vand.u32 2147483648, %v2000_v50  ;;  %vm2006_vm7 = vcmp.eq.f32.partialorder %v2000_v50, 0.0 }
0x1262   :  { %v2833_v51 = vpop.eup %2832 }
0x1263   :  { %v2835_v52 = vpop.eup %2834  ;;  %v2010_v53 = vmul.f32 %v2833_v51, %v2001_v47 }
0x1264   :  { %v2003_v61 = vmul.f32 %v2835_v52, %v2000_v50 }
0x1265   :  { %v2012_v2 = vsel %vm2011_vm4, %v2001_v47, %v2010_v53 }
0x1266   :  { %v2015_v4 = vsel %vm2013_vm5, %v2014_v60, %v2012_v2  ;;  %v2005_v8 = vsel %vm2004_vm6, %v2000_v50, %v2003_v61 }
0x1267   :  { %v2017_v9 = vadd.f32 1e-06, %v2015_v4  ;;  %v2008_v10 = vsel %vm2006_vm7, %v2007_v3, %v2005_v8 }
0x1268   :  { %v2016_v55 = vadd.f32 1e-06, %v2008_v10 }
0x1269   :  { %2836 = vrcp.f32 %v2017_v9 }
0x126a   :  { %2838 = vrcp.f32 %v2016_v55 }
0x1273   :  { %v2837_v59 = vpop.eup %2836 }
0x1274   :  { %v2839_v38 = vpop.eup %2838  ;;  %v2022_v62 = vmul.f32 %v2837_v59, %v2020_v58 }
0x1275   :  { %v2021_v63 = vmul.f32 %v2839_v38, %v2020_v58 }
0x1276   :  { %v2024_v12 = vmul.f32 %v2022_v62, %v1991_v40 }
0x1277   :  { %v2023_v32 = vmul.f32 %v2021_v63, %v1990_v1 }
0x1278   :  { %v2027_v14 = vadd.f32 %v2025_v6, %v2024_v12 }
0x1279   :  { %v2026_v45 = vadd.f32 %v2025_v6, %v2023_v32 }
0x127a   :  { %2029 = vst.msk [vmem:[#allocation5 + $0x8] sm:$0xff] %vm83_vm0, %v2027_v14 }
0x127b   :  { %2028 = vst.msk [vmem:[#allocation5] sm:$0xff] %vm83_vm0, %v2026_v45 }
0x127c   :  { %2863 = shalt.err (!%p2860_p9)
}
0x127d   :  { %s2864_s24 = scalar_lea.hbm %s3510_s16, 256 }
0x127e   :  { %p2865_p10 = scmp.ne.s32.totalorder %s3510_s16, %s2864_s24  ;;  %p2868_p11 = scmp.lt.u32.totalorder %s2864_s24, %s3510_s16 }
0x1280   :  { %p2870_p12 = pnand %p2868_p11, %p2865_p10 }
0x1282   :  { %2873 = shalt.err (!%p2870_p12)
}
0x1283   :  { %s2880_s28 = smov 128   ;;  %s2881_s2 = smov 8  }
0x1284   :  { %2041 = dma.vmem_to_hbm [thread:$0]  %s2036_s21, 256, %s3510_s16, [#allocation3], %s2880_s28, %s2880_s28, %s2881_s2  }
0x1285   :  { %2876 = dma.done.wait [#allocation3], 256  }
0x1286   :  { %2877 = vsyncadd [#allocation3], 4294967040 }
0x1287   :  { %2045 = vsyncpa [#allocation3], 1 }
0x1288   :  { %2046 = vsyncpa [#allocation4], 1 }

</bundles_post_ra>
